<compile_context>
chip_gen: v7x
topology: tpu7x:2x2x1
jax: 0.10.0
libtpu: 0.0.40
codegen_flags: <defaults>
</compile_context>

<pallas_src>
import numpy as np
import jax
import jax.numpy as jnp
from jax import lax
from jax.experimental import pallas as pl
from jax.experimental.pallas import tpu as pltpu


def _round_up(x, m):
    return (x + m - 1) // m * m


def _gather_onehot_kernel(idx_ref, f2_ref, o_ref):
    """Gather G rows of the per-image feat2 slab with one MXU matmul.

    idx_ref: (1, G)   int32 VMEM -- slab row index for each query of this chunk
    f2_ref : (C, HW)  VMEM       -- feat2 slab of image b, native channels-first layout
    o_ref  : (G, C)   VMEM       -- dense output block (single unmasked store)
    """
    HW = f2_ref.shape[1]
    G = o_ref.shape[0]
    rows = lax.broadcasted_iota(jnp.int32, (HW, G), 0)        # rows[r, g] = r
    onehot = (rows == idx_ref[...]).astype(f2_ref.dtype)      # (HW, G), one 1.0 per column
    # (C, HW) @ (HW, G) -> (C, G) on the MXU; HIGHEST keeps the f32 row-pick bit-exact.
    prod = jnp.dot(f2_ref[...], onehot,
                   preferred_element_type=jnp.float32,
                   precision=lax.Precision.HIGHEST)
    o_ref[...] = jnp.transpose(prod).astype(o_ref.dtype)      # (G, C), lane-dense store


def _gather_take_kernel(idx_ref, f2_ref, o_ref):
    """Row gather for large slabs (one-hot too big): Mosaic vector-gather path.

    idx_ref: (1, G)   int32 VMEM
    f2_ref : (HW, C)  VMEM -- channels-last slab of image b
    o_ref  : (G, C)   VMEM
    """
    o_ref[...] = jnp.take(f2_ref[...], idx_ref[0, :], axis=0, mode="clip")


_ONEHOT_MAX_HW = 4096          # above this the one-hot gather costs too many FLOPs
_ONEHOT_MAX_BYTES = 8 << 20    # cap on the in-kernel (HW, G) one-hot temp


def _vmem_budget_bytes():
    """Physical VMEM of this chip minus headroom for Pallas-internal scratch."""
    cap = 64 * 1024 * 1024     # conservative default (v7x per-TensorCore VMEM)
    try:
        cap = int(pltpu.get_tpu_info().vmem_capacity_bytes)
    except Exception:
        pass
    return max(cap - 8 * 1024 * 1024, 16 * 1024 * 1024)


def ngh_sampler3_forward(feat1, feat2, aflow, *, border, sub_q):
    """NghSampler3.forward (sub_q > 0 regular-grid branch).

    Returns (feat1_rows (N, C), feat2_rows (N, C), mask (N,) bool).  The final
    boolean compaction feat[mask] has a data-dependent output length, so the
    full gathered rows plus the mask are returned and compacted by the caller.
    """
    B, C, H, W = feat1.shape
    assert aflow.shape == (B, 2, H, W)
    assert sub_q > 0  # regular-grid branch of gen_grid
    HW = H * W

    # ---- static regular query grid -------------------------------------------
    xs = np.arange(border, W - border, sub_q)
    ys = np.arange(border, H - border, sub_q)
    H1, W1 = len(ys), len(xs)
    N_img = H1 * W1
    N = B * N_img
    assert N_img > 0

    # ---- feat1 at the grid: static strided slice (no gather kernel needed) ----
    f1_rows = jnp.transpose(
        feat1[:, :, border:H - border:sub_q, border:W - border:sub_q],
        (0, 2, 3, 1)).reshape(N, C)

    # ---- flow -> target indices + validity mask (plain jnp, XLA fuses it) -----
    afq = aflow[:, :, border:H - border:sub_q, border:W - border:sub_q]
    xf = afq[:, 0] + 0.5                              # (B, H1, W1)
    yf = afq[:, 1] + 0.5
    # Float-domain in-bounds test == torch's int test for finite flow values,
    # and it correctly rejects NaN / +-inf flow (all comparisons are False).
    mask = (xf > -1.0) & (yf > -1.0) & (xf < W) & (yf < H)
    # Clamp in float before the int cast (avoids cast overflow / NaN garbage),
    # clamp again in int so any value yields a safe in-slab index.
    x2 = jnp.clip(jnp.clip(xf, 0.0, W - 1.0).astype(jnp.int32), 0, W - 1)
    y2 = jnp.clip(jnp.clip(yf, 0.0, H - 1.0).astype(jnp.int32), 0, H - 1)
    idx_local = (y2 * W + x2).reshape(B, N_img).astype(jnp.int32)

    # ---- chunking: G queries per grid step, always a multiple of 128 ----------
    itemsize = feat2.dtype.itemsize
    G = min(_round_up(N_img, 128), 1024)
    while G > 128 and HW * G * itemsize > _ONEHOT_MAX_BYTES:
        G //= 2                                   # stays a multiple of 128
    N_pad = _round_up(N_img, G)
    num_chunks = N_pad // G
    if N_pad != N_img:
        # padding rows gather slab row 0 and are sliced off below
        idx_local = jnp.pad(idx_local, ((0, 0), (0, N_pad - N_img)))
    # blocked per-chunk index layout: each grid step sees a (1, G) index block
    idx_blk = idx_local.reshape(B, num_chunks, 1, G)

    # ---- feat2 gather kernel selection ----------------------------------------
    use_onehot = HW <= _ONEHOT_MAX_HW
    if use_onehot:
        # native channels-first slab: a free reshape, no HBM transpose of feat2
        f2_slab = feat2.reshape(B, C, HW)
        slab_block = (None, C, HW)
        kernel = _gather_onehot_kernel
        interm_bytes = HW * G * itemsize + 2 * C * G * 4
    else:
        # TODO(synk): produce feat2 channels-last upstream (or transpose the per-image
        # slab once in-kernel) to avoid this full HBM read+write of feat2 before the
        # kernel runs at production sizes.
        f2_slab = jnp.transpose(feat2, (0, 2, 3, 1)).reshape(B, HW, C)
        slab_block = (None, HW, C)
        kernel = _gather_take_kernel
        interm_bytes = (HW + G) * C * itemsize

    slab_bytes = C * HW * itemsize
    out_blk_bytes = G * C * itemsize
    idx_blk_bytes = G * 4
    other_bytes = 2 * out_blk_bytes + 2 * idx_blk_bytes + interm_bytes + (2 << 20)

    vmem_budget = _vmem_budget_bytes()
    # The slab is reused across all chunks of an image, so double-buffering only hides
    # one fetch per image; drop to a single buffer when it is large (v7x: 64 MiB VMEM).
    slab_kwargs = {}
    slab_bufs = 2
    if slab_bytes > (20 << 20) or 2 * slab_bytes + other_bytes > vmem_budget:
        slab_bufs = 1
        slab_kwargs = dict(pipeline_mode=pl.Buffered(1))
    vmem_needed = slab_bufs * slab_bytes + other_bytes
    # TODO(synk): if even the single-buffered slab exceeds the budget, cast the slab to
    # bf16 or fall back to a per-row DMA gather from HBM (memory_space=pl.ANY).
    vmem_limit = int(min(max(vmem_needed, 16 << 20), vmem_budget))

    f2_rows_pad = pl.pallas_call(
        kernel,
        grid=(B, num_chunks),
        in_specs=[
            # per-chunk row indices, streamed per grid step (not SMEM-resident)
            pl.BlockSpec((None, None, 1, G), lambda b, c: (b, c, 0, 0)),
            # per-image slab; its block index only depends on b, so the pipeline
            # fetches it once per image and reuses it across all index chunks.
            pl.BlockSpec(slab_block, lambda b, c: (b, 0, 0), **slab_kwargs),
        ],
        out_specs=pl.BlockSpec((None, G, C), lambda b, c: (b, c, 0)),
        out_shape=jax.ShapeDtypeStruct((B, N_pad, C), feat2.dtype),
        compiler_params=pltpu.CompilerParams(
            dimension_semantics=("parallel", "parallel"),
            vmem_limit_bytes=vmem_limit),
    )(idx_blk, f2_slab)

    f2_rows = f2_rows_pad[:, :N_img, :].reshape(N, C)
    return f1_rows, f2_rows, mask.reshape(N)


def _numpy_reference(feat1, feat2, aflow, border, sub_q):
    """NumPy replica of NghSampler3.forward (sub_q > 0 branch)."""
    feat1 = np.asarray(feat1); feat2 = np.asarray(feat2); aflow = np.asarray(aflow)
    B, C, H, W = feat1.shape
    xs = np.arange(border, W - border, sub_q)
    ys = np.arange(border, H - border, sub_q)
    H1, W1 = len(ys), len(xs)
    b1 = np.repeat(np.arange(B), H1 * W1)
    y1 = np.tile(np.repeat(ys, W1), B)
    x1 = np.tile(np.tile(xs, H1), B)
    f1 = feat1[b1, :, y1, x1]                                       # (N, C)
    xy2 = np.trunc(aflow[b1, :, y1, x1] + 0.5).astype(np.int64).T   # (2, N)
    mask = (xy2[0] >= 0) & (xy2[1] >= 0) & (xy2[0] < W) & (xy2[1] < H)
    x2 = np.clip(xy2[0], 0, W - 1)
    y2 = np.clip(xy2[1], 0, H - 1)
    f2 = feat2[b1, :, y2, x2]
    return f1[mask], f2[mask], mask


if __name__ == "__main__":
    B, C, H, W = 2, 128, 16, 16          # r2d2 descriptors are 128-d (lane dense)
    ngh = 2                              # NghSampler3(ngh=2): sub_q=1, border=ngh
    sub_q = 1
    border = ngh

    key = jax.random.PRNGKey(0)
    k1, k2, k3 = jax.random.split(key, 3)
    feat1 = jax.random.normal(k1, (B, C, H, W), dtype=jnp.float32)
    feat2 = jax.random.normal(k2, (B, C, H, W), dtype=jnp.float32)
    # flow targets; range extends past the image so the validity mask is exercised
    aflow = jax.random.uniform(k3, (B, 2, H, W), dtype=jnp.float32,
                               minval=-4.0, maxval=float(W) + 4.0)

    f1_rows, f2_rows, mask = ngh_sampler3_forward(feat1, feat2, aflow,
                                                  border=border, sub_q=sub_q)
    jax.block_until_ready((f1_rows, f2_rows, mask))

    mask_np = np.asarray(mask)
    # TODO(synk): the final feat[mask] compaction has a data-dependent output length
    # (no static-shape JAX/Pallas equivalent); compact on the host.
    feat1_out = np.asarray(f1_rows)[mask_np]
    feat2_out = np.asarray(f2_rows)[mask_np]

    ref1, ref2, ref_mask = _numpy_reference(feat1, feat2, aflow, border, sub_q)
    assert np.array_equal(mask_np, ref_mask), "mask mismatch"
    assert feat1_out.shape == ref1.shape and np.allclose(feat1_out, ref1, rtol=1e-5, atol=1e-5), \
        "feat1 mismatch"
    assert feat2_out.shape == ref2.shape and np.allclose(feat2_out, ref2, rtol=1e-5, atol=1e-5), \
        "feat2 mismatch"
    print("KERNEL_OK")
</pallas_src>

<mosaic_0001>
module attributes {stable_mosaic.version = 11 : i64} {
  func.func @_gather_onehot_kernel(%arg0: i32, %arg1: i32, %arg2: memref<1x1x1x256xi32, #tpu.memory_space<vmem>>, %arg3: memref<1x128x256xf32, #tpu.memory_space<vmem>>, %arg4: memref<1x256x128xf32, #tpu.memory_space<vmem>>) attributes {dimension_semantics = [#tpu.dimension_semantics<parallel>, #tpu.dimension_semantics<parallel>], iteration_bounds = array<i64: 2, 1>, scalar_prefetch = 0 : i64, scratch_operands = 0 : i64, tpu.core_type = #tpu.core_type<tc>, window_params = [{transform_indices = @transform_0, window_bounds = array<i64: 1, 1, 1, 256>}, {transform_indices = @transform_1, window_bounds = array<i64: 1, 128, 256>}, {transform_indices = @transform_2, window_bounds = array<i64: 1, 256, 128>}]} {
    %0 = tpu.iota {dimensions = array<i32: 0>} : vector<256x256xi32>
    %c0 = arith.constant 0 : index
    %c0_0 = arith.constant 0 : index
    %c0_1 = arith.constant 0 : index
    %c0_2 = arith.constant 0 : index
    %1 = vector.load %arg2[%c0, %c0_0, %c0_1, %c0_2] : memref<1x1x1x256xi32, #tpu.memory_space<vmem>>, vector<1x1x1x256xi32>
    %2 = vector.shape_cast %1 : vector<1x1x1x256xi32> to vector<1x256xi32>
    %3 = vector.broadcast %2 : vector<1x256xi32> to vector<256x256xi32>
    %4 = arith.cmpi eq, %0, %3 : vector<256x256xi32>
    %5 = arith.extui %4 : vector<256x256xi1> to vector<256x256xi32>
    %6 = arith.sitofp %5 : vector<256x256xi32> to vector<256x256xf32>
    %c0_3 = arith.constant 0 : index
    %c0_4 = arith.constant 0 : index
    %c0_5 = arith.constant 0 : index
    %7 = vector.load %arg3[%c0_3, %c0_4, %c0_5] : memref<1x128x256xf32, #tpu.memory_space<vmem>>, vector<1x128x256xf32>
    %8 = vector.shape_cast %7 : vector<1x128x256xf32> to vector<128x256xf32>
    %cst = arith.constant dense<0.000000e+00> : vector<128x256xf32>
    %9 = tpu.matmul %8, %6, %cst {dimension_numbers = #tpu.dot_dimension_numbers<[1], [0], [0], [1], [0, 0, 1, 1], [], []>, precision = #tpu.contract_precision<fp32>} : vector<128x256xf32>, vector<256x256xf32>, vector<128x256xf32> -> vector<128x256xf32>
    %10 = tpu.transpose %9, [1, 0] : vector<128x256xf32> -> vector<256x128xf32>
    %c0_6 = arith.constant 0 : index
    %c0_7 = arith.constant 0 : index
    %c0_8 = arith.constant 0 : index
    %11 = vector.load %arg4[%c0_6, %c0_7, %c0_8] : memref<1x256x128xf32, #tpu.memory_space<vmem>>, vector<1x256x128xf32>
    %12 = vector.shape_cast %11 : vector<1x256x128xf32> to vector<256x128xf32>
    %13 = vector.shape_cast %10 : vector<256x128xf32> to vector<1x256x128xf32>
    tpu.vector_store %arg4[%c0_6, %c0_7, %c0_8], %13 {strides = array<i32>} : memref<1x256x128xf32, #tpu.memory_space<vmem>>, vector<1x256x128xf32>,
    return
  }
  func.func @transform_0(%arg0: i32, %arg1: i32) -> (i32, i32, i32, i32) {
    %c0_i32 = arith.constant 0 : i32
    %c0_i32_0 = arith.constant 0 : i32
    %c0_i32_1 = arith.constant 0 : i32
    return %arg0, %arg1, %c0_i32, %c0_i32_0 : i32, i32, i32, i32
  }
  func.func @transform_1(%arg0: i32, %arg1: i32) -> (i32, i32, i32) {
    %c0_i32 = arith.constant 0 : i32
    %c0_i32_0 = arith.constant 0 : i32
    %c0_i32_1 = arith.constant 0 : i32
    return %arg0, %c0_i32, %c0_i32_0 : i32, i32, i32
  }
  func.func @transform_2(%arg0: i32, %arg1: i32) -> (i32, i32, i32) {
    %c0_i32 = arith.constant 0 : i32
    %c0_i32_0 = arith.constant 0 : i32
    return %arg0, %arg1, %c0_i32 : i32, i32, i32
  }
}

</mosaic_0001>

<bundles_post_ra>
// kernel: tpu_custom_call.1
= control target key start
LH: loop header
LB: loop body
LE: loop exit
PB: predicated region body
PF: predicated region fallthrough
CT: control target
= control target key end

     0   :  { %7 = vsyncpa [#allocation3], 0  ;;  %s5903_s0 = inlined_call_operand.hbm [shape: s32[2,1,1,256], index: 0, kind: input, shape index: {}]   ;;  %s5904_s1 = inlined_call_operand.hbm [shape: f32[2,128,256], index: 1, kind: input, shape index: {}]   ;;  %s5905_s2 = inlined_call_operand.hbm [shape: f32[2,256,128], index: 2, kind: output, shape index: {}]  }
   0x1   :  { %9 = vsyncpa [#allocation3 + $0x1], 0 }
   0x2   :  { %10 = vsyncpa [#allocation6], 0 }
   0x3   :  { %12 = vsyncpa [#allocation6 + $0x1], 0 }
   0x4   :  { %13 = vsyncpa [#allocation4], 0 }
   0x5   :  { %15 = vsyncpa [#allocation4 + $0x1], 0  ;;  %s3988_s9 = smov 0   ;;  %s3990_s10 = smov 0  }
   0x6   :  { %s3992_s11 = smov 0   ;;  %s3994_s12 = smov 0  }
   0x7   :  { %s3996_s13 = smov 0   ;;  %s3998_s14 = smov 0  }
   0x8 LB: > { %s2921_s15 = sadd.s32 4294967295, %s3962_s14   ;;  %s2922_s16 = sadd.s32 4294967294, %s3962_s14   ;;  %s3962_s14 = sphi %s3998_s14, %s21_s14   ;;  %s3958_s13 = sphi %s3996_s13, %s6560_s13   ;;  %s3954_s12 = sphi %s3994_s12, %s6559_s12   ;;  %s3950_s11 = sphi %s3992_s11, %s6558_s11   ;;  %s3946_s10 = sphi %s3990_s10, %s6557_s10   ;;  %s3942_s9 = sphi %s3988_s9, %s6556_s9  }
   0x9   : > { %s33_s17 = sadd.s32 1, %s3958_s13  ;;  %s42_s18 = sadd.s32 1, %s3950_s11 }
   0xa   : > { %p35_p0 = scmp.ge.s32.totalorder %s33_s17, 2  ;;  %p49_p1 = scmp.ne.s32.totalorder %s3950_s11, %s3946_s10 }
   0xb   : > { %p50_p2 = scmp.eq.s32.totalorder %s3962_s14, 0  ;;  %p55_p3 = scmp.ne.s32.totalorder %s3946_s10, %s3942_s9 }
   0xc   : > { %s6562_s17 = smov (%p35_p0, %s33_s17), 0  ;;  %p56_p5 = scmp.eq.s32.totalorder %s2921_s15, 0 }
   0xd   : > { %p4029_p4 = por %p50_p2, %p49_p1  ;;  %s37_s20 = ssub.s32 %s3958_s13, %s6562_s17 }
   0xe   : > { %p107_p6 = scmp.eq.s32.totalorder %s2921_s15, 1  ;;  %p40_p7 = scmp.eq.s32.totalorder %s37_s20, 0 }
   0xf   : > { %p4035_p8 = por %p56_p5, %p55_p3  ;;  %p113_p10 = scmp.eq.s32.totalorder %s2922_s16, 1 }
  0x10   : > { %p4039_p9 = por %p107_p6, %p49_p1  ;;  %p3760_p13 = scmp.lt.s32.totalorder %s3962_s14, 2 }
  0x11   : > { %s6117_s21 = scalar_select %p4035_p8, 1, 0 }
  0x12   : > { %s6118_s22 = scalar_select %p4039_p9, 1, 0 }
  0x13   : > { %s4044_s23 = scalar_select %p40_p7, %s3950_s11, %s42_s18  }
  0x14   : > { %p4046_p11 = por %p113_p10, %p55_p3  ;;  %s4053_s25 = sand.u32 1, %s3950_s11  }
  0x15   : > { %s2925_s26 = sshll.u32 %s4053_s25, 1  ;;  %s3196_s27 = sshll.u32 %s3958_s13, 5 }
  0x16   : > { %s6119_s24 = scalar_select %p4046_p11, 1, 0 }
  0x17   : > { %s4060_s30 = scalar_lea.hbm %s5903_s0, %s3196_s27  ;;  %s137_s3 = scalar_lea.vmem [#allocation2], %s2925_s26 }
  0x18   : > { %s147_s4 = sshll.u32 %s137_s3, 4  ;;  %p4066_p0 = pnand %p3760_p13, %p4029_p4  ;;  %s4062_s4 = int_to_ptr.vmem [resolvable:$true] %s147_s4 }
  0x19   : > { %s134_s6 = scalar_lea.sflag [#allocation3], %s4053_s25  ;;  %s3816_s7 = scalar_lea.hbm %s4060_s30, 32 }
  0x1a   : > { %p3817_p3 = scmp.ne.s32.totalorder %s4060_s30, %s3816_s7  ;;  %p3818_p5 = pneg %p4066_p0 }
  0x1b   : > { %s3821_s16 = scalar_lea.hbm %s5903_s0, 64  ;;  %p3822_p4 = scmp.lt.u32.totalorder %s4060_s30, %s5903_s0 }
  0x1c   : > { %p3819_p6 = pnand %p3818_p5, %p3817_p3  ;;  %p3823_p10 = scmp.lt.u32.totalorder %s3821_s16, %s3816_s7 }
  0x1d   : > { %p3825_p12 = scmp.lt.u32.totalorder %s3816_s7, %s4060_s30 }
  0x1e   : > { %p3820_p7 = pneg %p3819_p6  ;;  %p3824_p13 = por %p3823_p10, %p3822_p4 }
  0x20   : > { %p3826_p1 = por %p3825_p12, %p3824_p13 }
  0x22   : > { %p3827_p2 = pnand %p3826_p1, %p3820_p7 }
  0x24   : > { %3830 = shalt.err (!%p3827_p2)
}
  0x25   : > { %s3831_s20 = scalar_lea.vmem %s4062_s4, 32  ;;  %s3964_s26 = smov [#allocation2]  }
  0x26   : > { %p3832_p3 = scmp.ne.s32.totalorder %s4062_s4, %s3831_s20  ;;  %s3836_s27 = sshll.u32 %s3964_s26, 4  ;;  %s3837_s27 = int_to_ptr.vmem [resolvable:$false] %s3836_s27 }
  0x27   : > { %s3838_s28 = scalar_lea.vmem %s3837_s27, 64  ;;  %p3839_p9 = scmp.lt.s32.totalorder %s4062_s4, %s3837_s27 }
  0x28   : > { %p3834_p6 = pnand %p3832_p3, %p3818_p5  ;;  %p3840_p4 = scmp.lt.s32.totalorder %s3838_s28, %s3831_s20 }
  0x2a   : > { %p3835_p11 = pneg %p3834_p6  ;;  %p3841_p10 = por %p3840_p4, %p3839_p9 }
  0x2c   : > { %p3842_p12 = pnand %p3841_p10, %p3835_p11 }
  0x2e   : > { %3845 = shalt.err (!%p3842_p12)
}
  0x2f   : > { %3752 = dma.hbm_to_vmem [thread:$0]  (!%p4066_p0), %s4060_s30, 32, %s4062_s4, %s134_s6  }
  0x30   : > { %p6121_p1 = scmp.lt.s32.totalorder %s3962_s14, 3  ;;  %p6122_p2 = scmp.ge.s32.totalorder %s3962_s14, 1 }
  0x31   : > { %s2928_s3 = sshll.u32 %s4053_s25, 8  ;;  %s3197_s7 = sshll.u32 %s3958_s13, 12 }
  0x32   : > { %p4102_p7 = pnand %p6122_p2, %p6121_p1  ;;  %s4111_s16 = scalar_lea.hbm %s5904_s1, %s3197_s7 }
  0x33   : > { %s158_s18 = scalar_lea.vmem [#allocation5], %s2928_s3  ;;  %s155_s30 = scalar_lea.sflag [#allocation6], %s4053_s25 }
  0x34   : > { %s165_s19 = sshll.u32 %s158_s18, 4  ;;  %s3846_s4 = scalar_lea.hbm %s4111_s16, 4096  ;;  %s4113_s19 = int_to_ptr.vmem [resolvable:$true] %s165_s19 }
  0x35   : > { %p3847_p9 = scmp.ne.s32.totalorder %s4111_s16, %s3846_s4  ;;  %s3851_s26 = scalar_lea.hbm %s5904_s1, 8192 }
  0x36   : > { %p3852_p3 = scmp.lt.u32.totalorder %s4111_s16, %s5904_s1  ;;  %p3853_p6 = scmp.lt.u32.totalorder %s3851_s26, %s3846_s4 }
  0x37   : > { %p3849_p11 = pnand %p3847_p9, %p3818_p5  ;;  %p3855_p10 = scmp.lt.u32.totalorder %s3846_s4, %s4111_s16 }
  0x38   : > { %p3854_p4 = por %p3853_p6, %p3852_p3 }
  0x39   : > { %p3850_p13 = pneg %p3849_p11 }
  0x3a   : > { %p3856_p12 = por %p3855_p10, %p3854_p4 }
  0x3c   : > { %p3857_p1 = pnand %p3856_p12, %p3850_p13 }
  0x3e   : > { %3860 = shalt.err (!%p3857_p1)
}
  0x3f   : > { %s3861_s3 = scalar_lea.vmem %s4113_s19, 4096  ;;  %s3965_s7 = smov [#allocation5]  }
  0x40   : > { %p3862_p2 = scmp.ne.s32.totalorder %s4113_s19, %s3861_s3  ;;  %s3866_s8 = sshll.u32 %s3965_s7, 4  ;;  %s3867_s8 = int_to_ptr.vmem [resolvable:$false] %s3866_s8 }
  0x41   : > { %s3868_s15 = scalar_lea.vmem %s3867_s8, 8192  ;;  %p3869_p8 = scmp.lt.s32.totalorder %s4113_s19, %s3867_s8 }
  0x42   : > { %p3864_p9 = pnand %p3862_p2, %p3818_p5  ;;  %p3870_p3 = scmp.lt.s32.totalorder %s3868_s15, %s3861_s3 }
  0x44   : > { %p3865_p11 = pneg %p3864_p9  ;;  %p3871_p6 = por %p3870_p3, %p3869_p8 }
  0x46   : > { %p3872_p4 = pnand %p3871_p6, %p3865_p11 }
  0x48   : > { %3875 = shalt.err (!%p3872_p4)
}
  0x49   : > { %s3966_s18 = smov 256   ;;  %s3967_s4 = smov 16  }
  0x4a   : > { %3755 = dma.hbm_to_vmem [thread:$0]  (!%p4066_p0), %s4111_s16, 4096, %s4113_s19, %s155_s30, %s3966_s18, %s3966_s18, %s3967_s4  }
  0x4b   : > { %177 = sbr.rel (%p4102_p7) target bundleno = 768 (0x300), region = 28 }
  0x52   : > { %s4144_s6 = sand.u32 1, %s3946_s10   ;;  %p6124_p8 = scmp.ne.s32.totalorder %s6117_s21, 0 }
  0x53   : > { %s2932_s20 = sshll.u32 %s4144_s6, 1  ;;  %s180_s26 = scalar_lea.sflag [#allocation3], %s4144_s6 }
  0x54   : > { %s183_s27 = scalar_lea.vmem [#allocation2], %s2932_s20 }
  0x55   : > { %3929 = dma.done.wait (%p6124_p8), %s180_s26, 32  }
  0x56   : > { %3931 = vsyncadd (%p6124_p8), %s180_s26, 4294967264  ;;  %s2933_s25 = sshll.u32 %s4144_s6, 8  ;;  %s189_s5 = scalar_lea.sflag [#allocation6], %s4144_s6 }
  0x57   : > { %s4156_s29 = scalar_lea.vmem [#allocation5], %s2933_s25 }
  0x58   : > { %3933 = dma.done.wait (%p6124_p8), %s189_s5, 4096  }
  0x59   : > { %3935 = vsyncadd (%p6124_p8), %s189_s5, 4294963200  ;;  %v219_v0 = vlaneseq  ;;  %v252_v14 = vld [vmem:[%s183_s27] sm:$0x3]  ;;  %v5916_v27 = vmov 0.0   ;;  %v6125_v30 = vmov 0  ;;  %v6129_v36 = vmov 0 }
  0x5a   : > { %v5913_v33 = vmov 1.0|1.0   ;;  %v6134_v44 = vmov 0  ;;  %v6138_v51 = vmov 0  ;;  %v6141_v62 = vmov 0  ;;  %s5813_s21 = scalar_lea.vmem [#allocation7], %s2933_s25 }
  0x5b   : > { %v4162_v1 = vshrl.u32 %v219_v0, 7  ;;  %v6171_v60 = vmov 0  ;;  %v6179_v56 = vmov 0  ;;  %s3198_s16 = sshll.u32 %s3954_s12, 12  ;;  %s2811_s19 = sshll.u32 %s5813_s21, 4  ;;  %s5852_s19 = int_to_ptr.vmem [resolvable:$true] %s2811_s19 }
  0x5c   : > { %s5850_s3 = scalar_lea.hbm %s5905_s2, %s3198_s16  ;;  %s2796_s7 = scalar_lea.sflag [#allocation4], %s4144_s6 }
  0x5d   : > { %v221_v2 = vadd.s32 8, %v4162_v1  ;;  %v259_v3 = vsub.s32 1, %v4162_v1  ;;  %v255_v4 = vsub.s32 0, %v4162_v1  ;;  %v222_v5 = vadd.s32 16, %v4162_v1  ;;  %s3876_s12 = scalar_lea.vmem %s5852_s19, 4096  ;;  %p6553_p5 = scmp.ne.s32.totalorder %s6118_s22, 0 }
  0x5e   : > { %v223_v6 = vadd.s32 24, %v4162_v1  ;;  %v4170_v7 = vadd.s32 32, %v4162_v1  ;;  %v4173_v8 = vadd.s32 40, %v4162_v1  ;;  %v4176_v9 = vadd.s32 48, %v4162_v1  ;;  %p3877_p0 = scmp.ne.s32.totalorder %s5852_s19, %s3876_s12  ;;  %s3970_s8 = smov [#allocation7]  }
  0x5f   : > { %v4179_v10 = vadd.s32 56, %v4162_v1  ;;  %v4182_v11 = vadd.s32 64, %v4162_v1  ;;  %v4185_v12 = vadd.s32 72, %v4162_v1  ;;  %v4188_v13 = vadd.s32 80, %v4162_v1  ;;  %s3880_s15 = sshll.u32 %s3970_s8, 4  ;;  %s3881_s15 = int_to_ptr.vmem [resolvable:$false] %s3880_s15 }
  0x60   : > { %v4191_v15 = vadd.s32 88, %v4162_v1  ;;  %v4194_v16 = vadd.s32 96, %v4162_v1  ;;  %v4197_v17 = vadd.s32 104, %v4162_v1  ;;  %v4200_v18 = vadd.s32 112, %v4162_v1  ;;  %p3878_p7 = pnand %p3877_p0, %p6553_p5  ;;  %s3882_s18 = scalar_lea.vmem %s3881_s15, 8192 }
  0x61   : > { %v4202_v19 = vrot.slane %v252_v14, %v259_v3  ;;  %v4204_v20 = vrot.slane %v252_v14, %v255_v4  ;;  %v4207_v21 = vadd.s32 120, %v4162_v1  ;;  %v4210_v22 = vadd.s32 128, %v4162_v1  ;;  %p3883_p10 = scmp.lt.s32.totalorder %s5852_s19, %s3881_s15  ;;  %p3884_p12 = scmp.lt.s32.totalorder %s3882_s18, %s3876_s12 }
  0x62   : > { %v4213_v23 = vadd.s32 136, %v4162_v1  ;;  %v4216_v24 = vadd.s32 144, %v4162_v1  ;;  %v4219_v25 = vadd.s32 152, %v4162_v1  ;;  %v4222_v26 = vadd.s32 160, %v4162_v1  ;;  %p3879_p13 = pneg %p3878_p7 }
  0x63   : > { %vm262_vm0 = vcmp.eq.s32.totalorder %v4162_v1, %v4202_v19  ;;  %vm264_vm1 = vcmp.eq.s32.totalorder %v221_v2, %v4202_v19  ;;  %vm261_vm2 = vcmp.eq.s32.totalorder %v4162_v1, %v4204_v20  ;;  %vm263_vm3 = vcmp.eq.s32.totalorder %v221_v2, %v4204_v20  ;;  %p3885_p1 = por %p3884_p12, %p3883_p10 }
  0x64   : > { %v2936_v28 = vsel %vm262_vm0, 1.0, %v5916_v27  ;;  %v2938_v29 = vsel %vm264_vm1, 1.0, %v5916_v27  ;;  %vm4232_vm4 = vmpackc.low %vm264_vm1, %vm262_vm0  ;;  %v2935_v31 = vsel %vm261_vm2, 1.0, %v5916_v27  ;;  %v2937_v32 = vsel %vm263_vm3, 1.0, %v5916_v27 }
  0x65   : > { %v6126_v30 = vsel %vm4232_vm4, 4294967295, %v6125_v30  ;;  %3200 = vmatprep.subr.msk.bf16.mxu1 %vm4232_vm4, %v5913_v33  ;;  %v4241_v34 = vsub.f32 %v2936_v28, %v2936_v28  ;;  %v4243_v35 = vsub.f32 %v2938_v29, %v2938_v29  ;;  %3392 = vmatprep.subr.msk.bf16.mxu0 %vm4232_vm4, %v5913_v33  ;;  %vm4248_vm5 = vmpackc.low %vm263_vm3, %vm261_vm2  ;;  %v4252_v37 = vsub.f32 %v2935_v31, %v2935_v31  ;;  %p3886_p2 = pnand %p3885_p1, %p3879_p13 }
  0x66   : > { %6127 = vst [vmem:[#allocation11_spill] sm:$0xff] %v6126_v30  ;;  %v6130_v36 = vsel %vm4248_vm5, 4294967295, %v6129_v36  ;;  %v4255_v38 = vadd.s32 168, %v4162_v1  ;;  %3202 = vmatpush1.bf16.msk.msra.mxu1 %vm4248_vm5, %v5913_v33  ;;  %v4260_v39 = vsub.f32 %v2937_v32, %v2937_v32  ;;  %3394 = vmatpush1.bf16.msk.msra.mxu0 %vm4248_vm5, %v5913_v33  ;;  %vm266_vm6 = vcmp.eq.s32.totalorder %v222_v5, %v4202_v19 }
  0x67   : > { %6128 = vst [vmem:[#allocation12_spill] sm:$0xff] %v4243_v35  ;;  %6131 = vst [vmem:[#allocation13_spill] sm:$0xff] %v6130_v36  ;;  %vm268_vm7 = vcmp.eq.s32.totalorder %v223_v6, %v4202_v19  ;;  %v4268_v40 = vadd.s32 176, %v4162_v1  ;;  %v5911_v41 = vand.u32 4294901760, %v4252_v37  ;;  %v2940_v42 = vsel %vm266_vm6, 1.0, %v5916_v27 }
  0x68   : > { %6132 = vst [vmem:[#allocation14_spill] sm:$0xff] %v4252_v37  ;;  %6133 = vst [vmem:[#allocation15_spill] sm:$0xff] %v4260_v39  ;;  %v2942_v43 = vsel %vm268_vm7, 1.0, %v5916_v27  ;;  %vm265_vm9 = vcmp.eq.s32.totalorder %v222_v5, %v4204_v20  ;;  %v5909_v45 = vand.u32 4294901760, %v4260_v39  ;;  %v4282_v46 = vsub.f32 %v2940_v42, %v2940_v42 }
  0x69   : > { %vm4273_vm8 = vmpackc.low %vm268_vm7, %vm266_vm6  ;;  %v4284_v47 = vsub.f32 %v2942_v43, %v2942_v43  ;;  %vm267_vm10 = vcmp.eq.s32.totalorder %v223_v6, %v4204_v20  ;;  %v4293_v48 = vsub.f32 %v4252_v37, %v5911_v41  ;;  %v2939_v49 = vsel %vm265_vm9, 1.0, %v5916_v27 }
  0x6a   : > { %v6135_v44 = vsel %vm4273_vm8, 4294967295, %v6134_v44  ;;  %3204 = vmatprep.subr.msk.bf16.mxu1 %vm4273_vm8, %v5913_v33  ;;  %6137 = vst [vmem:[#allocation17_spill] sm:$0xff] %v4282_v46  ;;  %3396 = vmatprep.subr.msk.bf16.mxu0 %vm4273_vm8, %v5913_v33  ;;  %v2941_v50 = vsel %vm267_vm10, 1.0, %v5916_v27  ;;  %vm4297_vm11 = vmpackc.low %vm267_vm10, %vm265_vm9  ;;  %vm270_vm12 = vcmp.eq.s32.totalorder %v4170_v7, %v4202_v19  ;;  %v4306_v52 = vsub.f32 %v4260_v39, %v5909_v45 }
  0x6b   : > { %6136 = vst [vmem:[#allocation16_spill] sm:$0xff] %v6135_v44  ;;  %v6139_v51 = vsel %vm4297_vm11, 4294967295, %v6138_v51  ;;  %3206 = vmatpush1.bf16.msk.msra.mxu1 %vm4297_vm11, %v5913_v33  ;;  %v4311_v53 = vsub.f32 %v2939_v49, %v2939_v49  ;;  %v4313_v54 = vsub.f32 %v2941_v50, %v2941_v50  ;;  %3398 = vmatpush1.bf16.msk.msra.mxu0 %vm4297_vm11, %v5913_v33  ;;  %v2944_v55 = vsel %vm270_vm12, 1.0, %v5916_v27 }
  0x6c   : > { %6140 = vst [vmem:[#allocation18_spill] sm:$0xff] %v6139_v51  ;;  %vm272_vm13 = vcmp.eq.s32.totalorder %v4173_v8, %v4202_v19  ;;  %v4325_v57 = vsub.f32 %v2944_v55, %v2944_v55  ;;  %vm269_vm14 = vcmp.eq.s32.totalorder %v4170_v7, %v4204_v20  ;;  %vm271_vm0 = vcmp.eq.s32.totalorder %v4173_v8, %v4204_v20 }
  0x6d   : > { %v2946_v61 = vsel %vm272_vm13, 1.0, %v5916_v27  ;;  %vm4336_vm15 = vmpackc.low %vm272_vm13, %vm270_vm12  ;;  %v2943_v0 = vsel %vm269_vm14, 1.0, %v5916_v27  ;;  %vm274_vm1 = vcmp.eq.s32.totalorder %v4176_v9, %v4202_v19  ;;  %v2945_v2 = vsel %vm271_vm0, 1.0, %v5916_v27 }
  0x6e   : > { %v6142_v62 = vsel %vm4336_vm15, 4294967295, %v6141_v62  ;;  %3208 = vmatprep.subr.msk.bf16.mxu1 %vm4336_vm15, %v5913_v33  ;;  %v4343_v63 = vsub.f32 %v2946_v61, %v2946_v61  ;;  %3400 = vmatprep.subr.msk.bf16.mxu0 %vm4336_vm15, %v5913_v33  ;;  %vm4354_vm2 = vmpackc.low %vm271_vm0, %vm269_vm14  ;;  %v6144_v3 = vmov 0  ;;  %v4358_v4 = vsub.f32 %v2943_v0, %v2943_v0 }
  0x6f   : > { %6143 = vst [vmem:[#allocation19_spill] sm:$0xff] %v6142_v62  ;;  %v6145_v3 = vsel %vm4354_vm2, 4294967295, %v6144_v3  ;;  %vm276_vm3 = vcmp.eq.s32.totalorder %v4179_v10, %v4202_v19  ;;  %v2948_v5 = vsel %vm274_vm1, 1.0, %v5916_v27  ;;  %3210 = vmatpush1.bf16.msk.msra.mxu1 %vm4354_vm2, %v5913_v33  ;;  %v4366_v6 = vsub.f32 %v2945_v2, %v2945_v2  ;;  %3402 = vmatpush1.bf16.msk.msra.mxu0 %vm4354_vm2, %v5913_v33 }
  0x70   : > { %6146 = vst [vmem:[#allocation20_spill] sm:$0xff] %v6145_v3  ;;  %v2950_v7 = vsel %vm276_vm3, 1.0, %v5916_v27  ;;  %vm4372_vm6 = vmpackc.low %vm276_vm3, %vm274_vm1  ;;  %v6147_v8 = vmov 0  ;;  %v4376_v14 = vsub.f32 %v2948_v5, %v2948_v5  ;;  %vm273_vm7 = vcmp.eq.s32.totalorder %v4176_v9, %v4204_v20 }
  0x71   : > { %v6148_v8 = vsel %vm4372_vm6, 4294967295, %v6147_v8  ;;  %3212 = vmatprep.subr.msk.bf16.mxu1 %vm4372_vm6, %v5913_v33  ;;  %v4384_v29 = vsub.f32 %v2950_v7, %v2950_v7  ;;  %3404 = vmatprep.subr.msk.bf16.mxu0 %vm4372_vm6, %v5913_v33  ;;  %vm275_vm9 = vcmp.eq.s32.totalorder %v4179_v10, %v4204_v20  ;;  %v2947_v31 = vsel %vm273_vm7, 1.0, %v5916_v27 }
  0x72   : > { %6149 = vst [vmem:[#allocation21_spill] sm:$0xff] %v6148_v8  ;;  %v2949_v9 = vsel %vm275_vm9, 1.0, %v5916_v27  ;;  %vm4394_vm10 = vmpackc.low %vm275_vm9, %vm273_vm7  ;;  %v6150_v42 = vmov 0  ;;  %v4398_v43 = vsub.f32 %v2947_v31, %v2947_v31  ;;  %vm278_vm12 = vcmp.eq.s32.totalorder %v4182_v11, %v4202_v19 }
  0x73   : > { %v6151_v42 = vsel %vm4394_vm10, 4294967295, %v6150_v42  ;;  %v4402_v49 = vsub.f32 %v2949_v9, %v2949_v9  ;;  %vm280_vm13 = vcmp.eq.s32.totalorder %v4185_v12, %v4202_v19  ;;  %v2952_v10 = vsel %vm278_vm12, 1.0, %v5916_v27  ;;  %3214 = vmatpush1.bf16.msk.msra.mxu1 %vm4394_vm10, %v5913_v33  ;;  %3406 = vmatpush1.bf16.msk.msra.mxu0 %vm4394_vm10, %v5913_v33 }
  0x74   : > { %6152 = vst [vmem:[#allocation22_spill] sm:$0xff] %v6151_v42  ;;  %vm277_vm14 = vcmp.eq.s32.totalorder %v4182_v11, %v4204_v20  ;;  %v2954_v55 = vsel %vm280_vm13, 1.0, %v5916_v27  ;;  %vm4417_vm0 = vmpackc.low %vm280_vm13, %vm278_vm12  ;;  %v6153_v61 = vmov 0  ;;  %v4421_v0 = vsub.f32 %v2952_v10, %v2952_v10 }
  0x75   : > { %v6154_v61 = vsel %vm4417_vm0, 4294967295, %v6153_v61  ;;  %vm279_vm1 = vcmp.eq.s32.totalorder %v4185_v12, %v4204_v20  ;;  %3216 = vmatprep.subr.msk.bf16.mxu1 %vm4417_vm0, %v5913_v33  ;;  %v4429_v2 = vsub.f32 %v2954_v55, %v2954_v55  ;;  %3408 = vmatprep.subr.msk.bf16.mxu0 %vm4417_vm0, %v5913_v33  ;;  %v2951_v5 = vsel %vm277_vm14, 1.0, %v5916_v27 }
  0x76   : > { %6155 = vst [vmem:[#allocation23_spill] sm:$0xff] %v6154_v61  ;;  %v2953_v7 = vsel %vm279_vm1, 1.0, %v5916_v27  ;;  %vm4436_vm3 = vmpackc.low %vm279_vm1, %vm277_vm14  ;;  %v6156_v31 = vmov 0  ;;  %v4440_v12 = vsub.f32 %v2951_v5, %v2951_v5  ;;  %vm282_vm7 = vcmp.eq.s32.totalorder %v4188_v13, %v4202_v19 }
  0x77   : > { %v6157_v31 = vsel %vm4436_vm3, 4294967295, %v6156_v31  ;;  %v4442_v9 = vsub.f32 %v2953_v7, %v2953_v7  ;;  %vm284_vm9 = vcmp.eq.s32.totalorder %v4191_v15, %v4202_v19  ;;  %v2956_v10 = vsel %vm282_vm7, 1.0, %v5916_v27  ;;  %3218 = vmatpush1.bf16.msk.msra.mxu1 %vm4436_vm3, %v5913_v33  ;;  %3410 = vmatpush1.bf16.msk.msra.mxu0 %vm4436_vm3, %v5913_v33 }
  0x78   : > { %6158 = vst [vmem:[#allocation24_spill] sm:$0xff] %v6157_v31  ;;  %6159 = vst [vmem:[#allocation25_spill] sm:$0xff] %v4440_v12  ;;  %v2958_v55 = vsel %vm284_vm9, 1.0, %v5916_v27  ;;  %v6161_v11 = vmov 0  ;;  %vm281_vm13 = vcmp.eq.s32.totalorder %v4188_v13, %v4204_v20  ;;  %vm283_vm14 = vcmp.eq.s32.totalorder %v4191_v15, %v4204_v20 }
  0x79   : > { %6160 = vst [vmem:[#allocation26_spill] sm:$0xff] %v4442_v9  ;;  %vm4450_vm12 = vmpackc.low %vm284_vm9, %vm282_vm7  ;;  %v4466_v50 = vsub.f32 %v2956_v10, %v2956_v10  ;;  %v4468_v32 = vsub.f32 %v2958_v55, %v2958_v55  ;;  %v2955_v13 = vsel %vm281_vm13, 1.0, %v5916_v27  ;;  %v2957_v15 = vsel %vm283_vm14, 1.0, %v5916_v27 }
  0x7a   : > { %v6162_v11 = vsel %vm4450_vm12, 4294967295, %v6161_v11  ;;  %3220 = vmatprep.subr.msk.bf16.mxu1 %vm4450_vm12, %v5913_v33  ;;  %3412 = vmatprep.subr.msk.bf16.mxu0 %vm4450_vm12, %v5913_v33  ;;  %vm4478_vm1 = vmpackc.low %vm283_vm14, %vm281_vm13  ;;  %v6166_v7 = vmov 0  ;;  %vm286_vm7 = vcmp.eq.s32.totalorder %v4194_v16, %v4202_v19  ;;  %vm288_vm9 = vcmp.eq.s32.totalorder %v4197_v17, %v4202_v19 }
  0x7b   : > { %6163 = vst [vmem:[#allocation27_spill] sm:$0xff] %v6162_v11  ;;  %6164 = vst [vmem:[#allocation28_spill] sm:$0xff] %v4466_v50  ;;  %v6167_v7 = vsel %vm4478_vm1, 4294967295, %v6166_v7  ;;  %v4486_v10 = vsub.f32 %v2955_v13, %v2955_v13  ;;  %v4488_v55 = vsub.f32 %v2957_v15, %v2957_v15  ;;  %v2960_v5 = vsel %vm286_vm7, 1.0, %v5916_v27  ;;  %3222 = vmatpush1.bf16.msk.msra.mxu1 %vm4478_vm1, %v5913_v33 }
  0x7c   : > { %6165 = vst [vmem:[#allocation29_spill] sm:$0xff] %v4468_v32  ;;  %6168 = vst [vmem:[#allocation30_spill] sm:$0xff] %v6167_v7  ;;  %v2962_v28 = vsel %vm288_vm9, 1.0, %v5916_v27  ;;  %v4496_v59 = vsub.f32 %v2960_v5, %v2960_v5  ;;  %vm285_vm13 = vcmp.eq.s32.totalorder %v4194_v16, %v4204_v20  ;;  %vm287_vm14 = vcmp.eq.s32.totalorder %v4197_v17, %v4204_v20 }
  0x7d   : > { %6169 = vst [vmem:[#allocation31_spill] sm:$0xff] %v4486_v10  ;;  %6170 = vst [vmem:[#allocation32_spill] sm:$0xff] %v4488_v55  ;;  %v4498_v45 = vsub.f32 %v2962_v28, %v2962_v28  ;;  %3414 = vmatpush1.bf16.msk.msra.mxu0 %vm4478_vm1, %v5913_v33  ;;  %v2959_v28 = vsel %vm285_vm13, 1.0, %v5916_v27  ;;  %v2961_v5 = vsel %vm287_vm14, 1.0, %v5916_v27  ;;  %v6174_v16 = vmov 0 }
  0x7e   : > { %vm4492_vm12 = vmpackc.low %vm288_vm9, %vm286_vm7  ;;  %v4524_v17 = vsub.f32 %v2959_v28, %v2959_v28  ;;  %v4526_v15 = vsub.f32 %v2961_v5, %v2961_v5  ;;  %vm290_vm9 = vcmp.eq.s32.totalorder %v4200_v18, %v4202_v19  ;;  %v4531_v13 = vadd.s32 184, %v4162_v1 }
  0x7f   : > { %v6172_v60 = vsel %vm4492_vm12, 4294967295, %v6171_v60  ;;  %3224 = vmatprep.subr.msk.bf16.mxu1 %vm4492_vm12, %v5913_v33  ;;  %3416 = vmatprep.subr.msk.bf16.mxu0 %vm4492_vm12, %v5913_v33  ;;  %vm4520_vm7 = vmpackc.low %vm287_vm14, %vm285_vm13  ;;  %vm292_vm1 = vcmp.eq.s32.totalorder %v4207_v21, %v4202_v19  ;;  %v2964_v41 = vsel %vm290_vm9, 1.0, %v5916_v27  ;;  %vm289_vm13 = vcmp.eq.s32.totalorder %v4200_v18, %v4204_v20 }
  0x80   : > { %6173 = vst [vmem:[#allocation33_spill] sm:$0xff] %v6172_v60  ;;  %v6175_v16 = vsel %vm4520_vm7, 4294967295, %v6174_v16  ;;  %6177 = vst [vmem:[#allocation35_spill] sm:$0xff] %v4524_v17  ;;  %vm291_vm14 = vcmp.eq.s32.totalorder %v4207_v21, %v4204_v20  ;;  %v2966_v58 = vsel %vm292_vm1, 1.0, %v5916_v27  ;;  %v4547_v33 = vsub.f32 %v2964_v41, %v2964_v41 }
  0x81   : > { %6176 = vst [vmem:[#allocation34_spill] sm:$0xff] %v6175_v16  ;;  %6178 = vst [vmem:[#allocation36_spill] sm:$0xff] %v4526_v15  ;;  %v6182_v60 = vmov 1.0|1.0   ;;  %v4555_v21 = vsub.f32 %v2966_v58, %v2966_v58  ;;  %v2963_v5 = vsel %vm289_vm13, 1.0, %v5916_v27  ;;  %v2965_v28 = vsel %vm291_vm14, 1.0, %v5916_v27 }
  0x82   : > { %vm4543_vm12 = vmpackc.low %vm292_vm1, %vm290_vm9  ;;  %3226 = vmatpush1.bf16.msk.msra.mxu1 %vm4520_vm7, %v6182_v60  ;;  %3418 = vmatpush1.bf16.msk.msra.mxu0 %vm4520_vm7, %v6182_v60  ;;  %vm294_vm1 = vcmp.eq.s32.totalorder %v4210_v22, %v4202_v19  ;;  %v6183_v41 = vmov 0  ;;  %v4577_v58 = vsub.f32 %v2963_v5, %v2963_v5  ;;  %v4579_v27 = vsub.f32 %v2965_v28, %v2965_v28 }
  0x83   : > { %v6180_v56 = vsel %vm4543_vm12, 4294967295, %v6179_v56  ;;  %3228 = vmatprep.subr.msk.bf16.mxu1 %vm4543_vm12, %v6182_v60  ;;  %3420 = vmatprep.subr.msk.bf16.mxu0 %vm4543_vm12, %v6182_v60  ;;  %vm4573_vm9 = vmpackc.low %vm291_vm14, %vm289_vm13  ;;  %vm296_vm7 = vcmp.eq.s32.totalorder %v4213_v23, %v4202_v19  ;;  %v6188_v16 = vmov 0.0   ;;  %vm293_vm13 = vcmp.eq.s32.totalorder %v4210_v22, %v4204_v20 }
  0x84   : > { %6181 = vst [vmem:[#allocation37_spill] sm:$0xff] %v6180_v56  ;;  %v6184_v41 = vsel %vm4573_vm9, 4294967295, %v6183_v41  ;;  %6186 = vst [vmem:[#allocation39_spill] sm:$0xff] %v4577_v58  ;;  %v2968_v7 = vsel %vm294_vm1, 1.0, %v6188_v16  ;;  %v2970_v11 = vsel %vm296_vm7, 1.0, %v6188_v16  ;;  %v6189_v56 = vmov 0 }
  0x85   : > { %6185 = vst [vmem:[#allocation38_spill] sm:$0xff] %v6184_v41  ;;  %6187 = vst [vmem:[#allocation40_spill] sm:$0xff] %v4579_v27  ;;  %v4589_v18 = vsub.f32 %v2968_v7, %v2968_v7  ;;  %vm295_vm14 = vcmp.eq.s32.totalorder %v4213_v23, %v4204_v20  ;;  %v4597_v31 = vsub.f32 %v2970_v11, %v2970_v11  ;;  %v2967_v61 = vsel %vm293_vm13, 1.0, %v6188_v16 }
  0x86   : > { %vm4585_vm3 = vmpackc.low %vm296_vm7, %vm294_vm1  ;;  %3230 = vmatpush1.bf16.msk.msra.mxu1 %vm4573_vm9, %v6182_v60  ;;  %3422 = vmatpush1.bf16.msk.msra.mxu0 %vm4573_vm9, %v6182_v60  ;;  %v2969_v22 = vsel %vm295_vm14, 1.0, %v6188_v16  ;;  %v4607_v7 = vsub.f32 %v2967_v61, %v2967_v61  ;;  %vm298_vm7 = vcmp.eq.s32.totalorder %v4216_v24, %v4202_v19  ;;  %vm300_vm1 = vcmp.eq.s32.totalorder %v4219_v25, %v4202_v19 }
  0x87   : > { %v6190_v56 = vsel %vm4585_vm3, 4294967295, %v6189_v56  ;;  %3232 = vmatprep.subr.msk.bf16.mxu1 %vm4585_vm3, %v6182_v60  ;;  %3424 = vmatprep.subr.msk.bf16.mxu0 %vm4585_vm3, %v6182_v60  ;;  %vm4619_vm12 = vmpackc.low %vm295_vm14, %vm293_vm13  ;;  %v6193_v23 = vmov 0  ;;  %v4623_v61 = vsub.f32 %v2969_v22, %v2969_v22  ;;  %v2972_v11 = vsel %vm298_vm7, 1.0, %v6188_v16 }
  0x88   : > { %6191 = vst [vmem:[#allocation41_spill] sm:$0xff] %v6190_v56  ;;  %6192 = vst [vmem:[#allocation42_spill] sm:$0xff] %v4607_v7  ;;  %v6194_v23 = vsel %vm4619_vm12, 4294967295, %v6193_v23  ;;  %v2974_v5 = vsel %vm300_vm1, 1.0, %v6188_v16  ;;  %vm297_vm9 = vcmp.eq.s32.totalorder %v4216_v24, %v4204_v20  ;;  %v6197_v41 = vmov 0 }
  0x89   : > { %6195 = vst [vmem:[#allocation43_spill] sm:$0xff] %v6194_v23  ;;  %6196 = vst [vmem:[#allocation44_spill] sm:$0xff] %v4623_v61  ;;  %v4634_v56 = vsub.f32 %v2972_v11, %v2972_v11  ;;  %v4636_v42 = vsub.f32 %v2974_v5, %v2974_v5  ;;  %vm299_vm13 = vcmp.eq.s32.totalorder %v4219_v25, %v4204_v20  ;;  %v2971_v8 = vsel %vm297_vm9, 1.0, %v6188_v16 }
  0x8a   : > { %vm4630_vm0 = vmpackc.low %vm300_vm1, %vm298_vm7  ;;  %v2973_v28 = vsel %vm299_vm13, 1.0, %v6188_v16  ;;  %vm5933_vm14 = vcmp.eq.s32.totalorder %v4222_v26, %v4202_v19  ;;  %3234 = vmatpush1.bf16.msk.msra.mxu1 %vm4619_vm12, %v6182_v60  ;;  %3426 = vmatpush1.bf16.msk.msra.mxu0 %vm4619_vm12, %v6182_v60  ;;  %v4654_v25 = vsub.f32 %v2971_v8, %v2971_v8  ;;  %vm304_vm7 = vcmp.eq.s32.totalorder %v4255_v38, %v4202_v19 }
  0x8b   : > { %v6198_v41 = vsel %vm4630_vm0, 4294967295, %v6197_v41  ;;  %v4656_v5 = vsub.f32 %v2973_v28, %v2973_v28  ;;  %v2976_v11 = vsel %vm5933_vm14, 1.0, %v6188_v16  ;;  %3236 = vmatprep.subr.msk.bf16.mxu1 %vm4630_vm0, %v6182_v60  ;;  %3428 = vmatprep.subr.msk.bf16.mxu0 %vm4630_vm0, %v6182_v60  ;;  %vm4673_vm1 = vmpackc.low %vm299_vm13, %vm297_vm9  ;;  %v6202_v8 = vmov 0 }
  0x8c   : > { %6199 = vst [vmem:[#allocation45_spill] sm:$0xff] %v6198_v41  ;;  %6200 = vst [vmem:[#allocation46_spill] sm:$0xff] %v4654_v25  ;;  %v6203_v8 = vsel %vm4673_vm1, 4294967295, %v6202_v8  ;;  %v2978_v28 = vsel %vm304_vm7, 1.0, %v6188_v16  ;;  %v4678_v22 = vsub.f32 %v2976_v11, %v2976_v11  ;;  %vm301_vm14 = vcmp.eq.s32.totalorder %v4222_v26, %v4204_v20 }
  0x8d   : > { %6201 = vst [vmem:[#allocation47_spill] sm:$0xff] %v4656_v5  ;;  %6204 = vst [vmem:[#allocation48_spill] sm:$0xff] %v6203_v8  ;;  %vm5939_vm12 = vcmp.eq.s32.totalorder %v4255_v38, %v4204_v20  ;;  %vm6206_vm9 = vcmp.eq.s32.totalorder %v4222_v26, %v4202_v19  ;;  %v6207_v24 = vmov 0  ;;  %v4693_v3 = vsub.f32 %v2978_v28, %v2978_v28  ;;  %v455_v5 = vld [vmem:[%s4156_s29 + $0x10] sm:$0xff] }
  0x8e   : > { %6205 = vst [vmem:[#allocation49_spill] sm:$0xff] %v4678_v22  ;;  %vm4689_vm13 = vmpackc.low %vm304_vm7, %vm6206_vm9  ;;  %v2975_v11 = vsel %vm301_vm14, 1.0, %v6188_v16  ;;  %v2977_v41 = vsel %vm5939_vm12, 1.0, %v6188_v16  ;;  %vm5940_vm7 = vcmp.eq.s32.totalorder %v4268_v40, %v4202_v19  ;;  %vm5946_vm9 = vcmp.eq.s32.totalorder %v4531_v13, %v4202_v19  ;;  %3238 = vmatpush1.bf16.msk.msra.mxu1 %vm4673_vm1, %v6182_v60  ;;  %3430 = vmatpush1.bf16.msk.msra.mxu0 %vm4673_vm1, %v6182_v60 }
  0x8f   : > { %v6208_v24 = vsel %vm4689_vm13, 4294967295, %v6207_v24  ;;  %6210 = vst [vmem:[#allocation51_spill] sm:$0xff] %v4693_v3  ;;  %v4703_v23 = vsub.f32 %v2975_v11, %v2975_v11  ;;  %v4715_v28 = vsub.f32 %v2977_v41, %v2977_v41  ;;  %v2980_v11 = vsel %vm5940_vm7, 1.0, %v6188_v16  ;;  %3240 = vmatprep.subr.msk.bf16.mxu1 %vm4689_vm13, %v6182_v60  ;;  %3432 = vmatprep.subr.msk.bf16.mxu0 %vm4689_vm13, %v6182_v60 }
  0x90   : > { %6209 = vst [vmem:[#allocation50_spill] sm:$0xff] %v6208_v24  ;;  %v2982_v62 = vsel %vm5946_vm9, 1.0, %v6188_v16  ;;  %vm6213_vm7 = vcmp.eq.s32.totalorder %v4255_v38, %v4204_v20  ;;  %v6214_v41 = vmov 0  ;;  %v4744_v51 = vsub.f32 %v2980_v11, %v2980_v11 }
  0x91   : > { %6211 = vst [vmem:[#allocation52_spill] sm:$0xff] %v4703_v23  ;;  %6212 = vst [vmem:[#allocation53_spill] sm:$0xff] %v4715_v28  ;;  %v4746_v44 = vsub.f32 %v2982_v62, %v2982_v62  ;;  %vm307_vm12 = vcmp.eq.s32.totalorder %v4531_v13, %v4204_v20  ;;  %vm6219_vm9 = vcmp.eq.s32.totalorder %v4268_v40, %v4202_v19  ;;  %v6221_v26 = vmov 0 }
  0x92   : > { %vm4739_vm1 = vmpackc.low %vm6213_vm7, %vm301_vm14  ;;  %6217 = vst [vmem:[#allocation55_spill] sm:$0xff] %v4744_v51  ;;  %vm6220_vm14 = vcmp.eq.s32.totalorder %v4531_v13, %v4202_v19  ;;  %vm6224_vm13 = vcmp.eq.s32.totalorder %v4268_v40, %v4204_v20  ;;  %v2981_v62 = vsel %vm307_vm12, 1.0, %v6188_v16  ;;  %v244_v11 = vadd.s32 192, %v4162_v1 }
  0x93   : > { %v6215_v41 = vsel %vm4739_vm1, 4294967295, %v6214_v41  ;;  %6218 = vst [vmem:[#allocation56_spill] sm:$0xff] %v4746_v44  ;;  %vm4757_vm7 = vmpackc.low %vm6220_vm14, %vm6219_vm9  ;;  %v2979_v38 = vsel %vm6224_vm13, 1.0, %v6188_v16  ;;  %v4772_v8 = vsub.f32 %v2981_v62, %v2981_v62  ;;  %v245_v36 = vadd.s32 200, %v4162_v1  ;;  %3242 = vmatpush1.bf16.msk.msra.mxu1 %vm4739_vm1, %v6182_v60  ;;  %3434 = vmatpush1.bf16.msk.msra.mxu0 %vm4739_vm1, %v6182_v60 }
  0x94   : > { %6216 = vst [vmem:[#allocation54_spill] sm:$0xff] %v6215_v41  ;;  %v6222_v26 = vsel %vm4757_vm7, 4294967295, %v6221_v26  ;;  %v4770_v24 = vsub.f32 %v2979_v38, %v2979_v38  ;;  %v246_v30 = vadd.s32 208, %v4162_v1  ;;  %vm310_vm13 = vcmp.eq.s32.totalorder %v244_v11, %v4202_v19  ;;  %3244 = vmatprep.subr.msk.bf16.mxu1 %vm4757_vm7, %v6182_v60  ;;  %3436 = vmatprep.subr.msk.bf16.mxu0 %vm4757_vm7, %v6182_v60 }
  0x95   : > { %6223 = vst [vmem:[#allocation57_spill] sm:$0xff] %v6222_v26  ;;  %6226 = vst [vmem:[#allocation59_spill] sm:$0xff] %v4772_v8  ;;  %v247_v38 = vadd.s32 216, %v4162_v1  ;;  %v4786_v62 = vadd.s32 224, %v4162_v1  ;;  %vm6227_vm14 = vcmp.eq.s32.totalorder %v4268_v40, %v4204_v20  ;;  %v6228_v41 = vmov 0 }
  0x96   : > { %6225 = vst [vmem:[#allocation58_spill] sm:$0xff] %v4770_v24  ;;  %vm4800_vm9 = vmpackc.low %vm307_vm12, %vm6227_vm14  ;;  %vm312_vm1 = vcmp.eq.s32.totalorder %v245_v36, %v4202_v19  ;;  %v2984_v28 = vsel %vm310_vm13, 1.0, %v6188_v16  ;;  %v6231_v23 = vmov 0  ;;  %vm311_vm12 = vcmp.eq.s32.totalorder %v245_v36, %v4204_v20 }
  0x97   : > { %v6229_v41 = vsel %vm4800_vm9, 4294967295, %v6228_v41  ;;  %v2986_v26 = vsel %vm312_vm1, 1.0, %v6188_v16  ;;  %vm4809_vm7 = vmpackc.low %vm312_vm1, %vm310_vm13  ;;  %v4813_v40 = vsub.f32 %v2984_v28, %v2984_v28  ;;  %vm6235_vm14 = vcmp.eq.s32.totalorder %v244_v11, %v4204_v20  ;;  %3246 = vmatpush1.bf16.msk.msra.mxu1 %vm4800_vm9, %v6182_v60  ;;  %3438 = vmatpush1.bf16.msk.msra.mxu0 %vm4800_vm9, %v6182_v60 }
  0x98   : > { %6230 = vst [vmem:[#allocation60_spill] sm:$0xff] %v6229_v41  ;;  %v6232_v23 = vsel %vm4809_vm7, 4294967295, %v6231_v23  ;;  %v2983_v13 = vsel %vm6235_vm14, 1.0, %v6188_v16  ;;  %v4819_v44 = vsub.f32 %v2986_v26, %v2986_v26  ;;  %v2985_v51 = vsel %vm311_vm12, 1.0, %v6188_v16  ;;  %3248 = vmatprep.subr.msk.bf16.mxu1 %vm4809_vm7, %v6182_v60  ;;  %3440 = vmatprep.subr.msk.bf16.mxu0 %vm4809_vm7, %v6182_v60  ;;  %vm4846_vm9 = vmpackc.low %vm311_vm12, %vm6235_vm14 }
  0x99   : > { %6233 = vst [vmem:[#allocation61_spill] sm:$0xff] %v6232_v23  ;;  %6234 = vst [vmem:[#allocation62_spill] sm:$0xff] %v4813_v40  ;;  %v4822_v8 = vsub.f32 %v2983_v13, %v2983_v13  ;;  %vm314_vm0 = vcmp.eq.s32.totalorder %v246_v30, %v4202_v19  ;;  %v4831_v36 = vsub.f32 %v2985_v51, %v2985_v51  ;;  %v6239_v51 = vmov 0 }
  0x9a   : > { %6236 = vst [vmem:[#allocation63_spill] sm:$0xff] %v4819_v44  ;;  %vm316_vm1 = vcmp.eq.s32.totalorder %v247_v38, %v4202_v19  ;;  %v2988_v28 = vsel %vm314_vm0, 1.0, %v6188_v16  ;;  %v6240_v51 = vsel %vm4846_vm9, 4294967295, %v6239_v51  ;;  %vm315_vm13 = vcmp.eq.s32.totalorder %v247_v38, %v4204_v20 }
  0x9b   : > { %6237 = vst [vmem:[#allocation64_spill] sm:$0xff] %v4822_v8  ;;  %6238 = vst [vmem:[#allocation65_spill] sm:$0xff] %v4831_v36  ;;  %v2990_v13 = vsel %vm316_vm1, 1.0, %v6188_v16  ;;  %v4852_v41 = vsub.f32 %v2988_v28, %v2988_v28  ;;  %v6243_v23 = vmov 0  ;;  %vm6247_vm12 = vcmp.eq.s32.totalorder %v246_v30, %v4204_v20  ;;  %3250 = vmatpush1.bf16.msk.msra.mxu1 %vm4846_vm9, %v6182_v60  ;;  %3442 = vmatpush1.bf16.msk.msra.mxu0 %vm4846_vm9, %v6182_v60 }
  0x9c   : > { %6241 = vst [vmem:[#allocation66_spill] sm:$0xff] %v6240_v51  ;;  %vm4858_vm3 = vmpackc.low %vm316_vm1, %vm314_vm0  ;;  %v4862_v11 = vsub.f32 %v2990_v13, %v2990_v13  ;;  %v2987_v26 = vsel %vm6247_vm12, 1.0, %v6188_v16  ;;  %v2989_v28 = vsel %vm315_vm13, 1.0, %v6188_v16  ;;  %v249_v44 = vadd.s32 232, %v4162_v1 }
  0x9d   : > { %6242 = vst [vmem:[#allocation67_spill] sm:$0xff] %v4852_v41  ;;  %v6244_v23 = vsel %vm4858_vm3, 4294967295, %v6243_v23  ;;  %v4870_v41 = vsub.f32 %v2987_v26, %v2987_v26  ;;  %v4872_v8 = vsub.f32 %v2989_v28, %v2989_v28  ;;  %vm318_vm0 = vcmp.eq.s32.totalorder %v4786_v62, %v4202_v19  ;;  %3252 = vmatprep.subr.msk.bf16.mxu1 %vm4858_vm3, %v6182_v60  ;;  %vm6250_vm14 = vmmov %vm6247_vm12 }
  0x9e   : > { %6245 = vst [vmem:[#allocation68_spill] sm:$0xff] %v6244_v23  ;;  %6246 = vst [vmem:[#allocation69_spill] sm:$0xff] %v4862_v11  ;;  %v2992_v26 = vsel %vm318_vm0, 1.0, %v6188_v16  ;;  %v250_v13 = vadd.s32 240, %v4162_v1  ;;  %v251_v28 = vadd.s32 248, %v4162_v1  ;;  %3444 = vmatprep.subr.msk.bf16.mxu0 %vm4858_vm3, %v6182_v60  ;;  %v6251_v51 = vmov 0 }
  0x9f   : > { %6248 = vst [vmem:[#allocation70_spill] sm:$0xff] %v4870_v41  ;;  %6249 = vst [vmem:[#allocation71_spill] sm:$0xff] %v4872_v8  ;;  %vm320_vm1 = vcmp.eq.s32.totalorder %v249_v44, %v4202_v19  ;;  %v4908_v36 = vsub.f32 %v2992_v26, %v2992_v26  ;;  %v6255_v30 = vmov 0  ;;  %v6277_v24 = vand.u32 4294901760, %v4252_v37 }
  0xa0   : > { %vm4901_vm12 = vmpackc.low %vm315_vm13, %vm6250_vm14  ;;  %v2994_v23 = vsel %vm320_vm1, 1.0, %v6188_v16  ;;  %vm319_vm13 = vcmp.eq.s32.totalorder %v249_v44, %v4204_v20  ;;  %vm6258_vm14 = vcmp.eq.s32.totalorder %v4786_v62, %v4204_v20  ;;  %vm5982_vm9 = vcmp.eq.s32.totalorder %v250_v13, %v4202_v19 }
  0xa1   : > { %v6252_v51 = vsel %vm4901_vm12, 4294967295, %v6251_v51  ;;  %6254 = vst [vmem:[#allocation73_spill] sm:$0xff] %v4908_v36  ;;  %vm4914_vm3 = vmpackc.low %vm320_vm1, %vm318_vm0  ;;  %v2991_v38 = vsel %vm6258_vm14, 1.0, %v6188_v16  ;;  %v4924_v26 = vsub.f32 %v2994_v23, %v2994_v23  ;;  %v2993_v1 = vsel %vm319_vm13, 1.0, %v6188_v16  ;;  %v454_v36 = vld [vmem:[%s4156_s29 + $0x8] sm:$0xff]  ;;  %3254 = vmatpush1.bf16.msk.msra.mxu1 %vm4901_vm12, %v6182_v60  ;;  %3446 = vmatpush1.bf16.msk.msra.mxu0 %vm4901_vm12, %v6182_v60 }
  0xa2   : > { %6253 = vst [vmem:[#allocation72_spill] sm:$0xff] %v6252_v51  ;;  %v6256_v30 = vsel %vm4914_vm3, 4294967295, %v6255_v30  ;;  %v4929_v11 = vsub.f32 %v2991_v38, %v2991_v38  ;;  %vm5988_vm0 = vcmp.eq.s32.totalorder %v251_v28, %v4202_v19  ;;  %v4939_v8 = vsub.f32 %v2993_v1, %v2993_v1  ;;  %3256 = vmatprep.subr.msk.bf16.mxu1 %vm4914_vm3, %v6182_v60 }
  0xa3   : > { %6257 = vst [vmem:[#allocation74_spill] sm:$0xff] %v6256_v30  ;;  %6259 = vst [vmem:[#allocation75_spill] sm:$0xff] %v4924_v26  ;;  %v2996_v23 = vsel %vm5982_vm9, 1.0, %v6188_v16  ;;  %v2998_v38 = vsel %vm5988_vm0, 1.0, %v6188_v16  ;;  %v453_v26 = vld [vmem:[%s4156_s29] sm:$0xff]  ;;  %3448 = vmatprep.subr.msk.bf16.mxu0 %vm4914_vm3, %v6182_v60  ;;  %v6262_v1 = vmov 0  ;;  %vm323_vm1 = vcmp.eq.s32.totalorder %v251_v28, %v4204_v20 }
  0xa4   : > { %6260 = vst [vmem:[#allocation76_spill] sm:$0xff] %v4929_v11  ;;  %6261 = vst [vmem:[#allocation77_spill] sm:$0xff] %v4939_v8  ;;  %v4965_v41 = vsub.f32 %v2996_v23, %v2996_v23  ;;  %v4967_v40 = vsub.f32 %v2998_v38, %v2998_v38  ;;  %vm6267_vm0 = vcmp.eq.s32.totalorder %v250_v13, %v4202_v19  ;;  %v6269_v44 = vmov 0 }
  0xa5   : > { %vm4960_vm9 = vmpackc.low %vm319_vm13, %vm6258_vm14  ;;  %vm6268_vm3 = vcmp.eq.s32.totalorder %v251_v28, %v4202_v19  ;;  %vm6272_vm13 = vcmp.eq.s32.totalorder %v250_v13, %v4204_v20  ;;  %v2997_v23 = vsel %vm323_vm1, 1.0, %v6188_v16  ;;  %v4985_v38 = vand.u32 4294901760, %v454_v36  ;;  %v458_v20 = vld [vmem:[%s4156_s29 + $0x28] sm:$0xff] }
  0xa6   : > { %v6263_v1 = vsel %vm4960_vm9, 4294967295, %v6262_v1  ;;  %6265 = vst [vmem:[#allocation79_spill] sm:$0xff] %v4965_v41  ;;  %6266 = vst [vmem:[#allocation80_spill] sm:$0xff] %v4967_v40  ;;  %v2995_v62 = vsel %vm6272_vm13, 1.0, %v6188_v16  ;;  %v4989_v51 = vsub.f32 %v2997_v23, %v2997_v23  ;;  %v4991_v19 = vand.u32 4294901760, %v453_v26  ;;  %v456_v41 = vld [vmem:[%s4156_s29 + $0x18] sm:$0xff]  ;;  %3258 = vmatpush1.bf16.msk.msra.mxu1 %vm4960_vm9, %v6182_v60  ;;  %3450 = vmatpush1.bf16.msk.msra.mxu0 %vm4960_vm9, %v6182_v60 }
  0xa7   : > { %6264 = vst [vmem:[#allocation78_spill] sm:$0xff] %v6263_v1  ;;  %vm4975_vm12 = vmpackc.low %vm6268_vm3, %vm6267_vm0  ;;  %v4987_v30 = vsub.f32 %v2995_v62, %v2995_v62  ;;  %v872_v40 = vand.u32 4294901760, %v4241_v34  ;;  %v5002_v16 = vsub.f32 %v454_v36, %v4985_v38  ;;  %v884_v62 = vand.u32 4294901760, %v4243_v35 }
  0xa8   : > { %v6270_v44 = vsel %vm4975_vm12, 4294967295, %v6269_v44  ;;  %6273 = vst [vmem:[#allocation82_spill] sm:$0xff] %v4991_v19  ;;  %v6275_v23 = vand.u32 4294901760, %v4293_v48  ;;  %v6276_v8 = vand.u32 4294901760, %v4306_v52  ;;  %v6278_v3 = vand.u32 4294901760, %v4260_v39  ;;  %3260 = vmatprep.subr.msk.bf16.mxu1 %vm4975_vm12, %v6182_v60  ;;  %3452 = vmatprep.subr.msk.bf16.mxu0 %vm4975_vm12, %v6182_v60  ;;  %vm6279_vm3 = vmmov %vm6272_vm13 }
  0xa9   : > { %6271 = vst [vmem:[#allocation81_spill] sm:$0xff] %v6270_v44  ;;  %6274 = vst [vmem:[#allocation83_spill] sm:$0xff] %v5002_v16  ;;  %v6280_v48 = vmov 0  ;;  %v615_v36 = vand.u32 4294901760, %v5002_v16  ;;  %v3455_v13 = vpack.c.bf16 %v884_v62, %v872_v40  ;;  %v5036_v44 = vand.u32 4294901760, %v456_v41 }
  0xaa   : > { %v3265_v11 = vpack.c.bf16 %v6276_v8, %v6275_v23  ;;  %v3457_v22 = vpack.c.bf16 %v6278_v3, %v6277_v24  ;;  %vm5024_vm0 = vmpackc.low %vm323_vm1, %vm6279_vm3  ;;  %v5031_v8 = vsub.f32 %v453_v26, %v4991_v19  ;;  %v873_v24 = vsub.f32 %v4241_v34, %v872_v40 }
  0xab   : > { %v6281_v48 = vsel %vm5024_vm0, 4294967295, %v6280_v48  ;;  %v885_v23 = vsub.f32 %v4243_v35, %v884_v62  ;;  %6284 = vst [vmem:[#allocation86_spill] sm:$0xff] %v5036_v44  ;;  %v5040_v39 = vand.u32 4294901760, %v455_v5  ;;  %v896_v3 = vand.u32 4294901760, %v4282_v46  ;;  %3262 = vmatpush1.bf16.msk.msra.mxu1 %vm5024_vm0, %v6182_v60  ;;  %3454 = vmatpush1.bf16.msk.msra.mxu0 %vm5024_vm0, %v6182_v60 }
  0xac   : > { %6282 = vst [vmem:[#allocation84_spill] sm:$0xff] %v6281_v48  ;;  %6283 = vst [vmem:[#allocation85_spill] sm:$0xff] %v5031_v8  ;;  %v621_v28 = vand.u32 4294901760, %v5031_v8  ;;  %v874_v1 = vand.u32 4294901760, %v873_v24  ;;  %v616_v40 = vsub.f32 %v5002_v16, %v615_v36  ;;  %v5051_v62 = vsub.f32 %v456_v41, %v5036_v44  ;;  %1867 = vmatprep.mubr.f32.mxu0 %v615_v36  ;;  %v457_v16 = vld [vmem:[%s4156_s29 + $0x20] sm:$0xff] }
  0xad   : > { %6285 = vst [vmem:[#allocation87_spill] sm:$0xff] %v5040_v39  ;;  %v886_v26 = vand.u32 4294901760, %v885_v23  ;;  %v908_v24 = vand.u32 4294901760, %v4284_v47  ;;  %3456 = vmatprep.subr.bf16.mxu0 %v3455_v13  ;;  %v5056_v37 = vsub.f32 %v455_v5, %v5040_v39  ;;  %v897_v19 = vsub.f32 %v4282_v46, %v896_v3 }
  0xae   : > { %6286 = vst [vmem:[#allocation88_spill] sm:$0xff] %v5051_v62  ;;  %v622_v52 = vsub.f32 %v5031_v8, %v621_v28  ;;  %v5059_v48 = vand.u32 4294901760, %v458_v20  ;;  %v617_v60 = vand.u32 4294901760, %v616_v40  ;;  %v631_v23 = vand.u32 4294901760, %v5051_v62  ;;  %1871 = vmatmul.mubr.f32.vlgmr.msra.gmra.mrb[0].mxu0 %v621_v28 }
  0xaf   : > { %6287 = vst [vmem:[#allocation89_spill] sm:$0xff] %v5056_v37  ;;  %v3263_v35 = vpack.c.bf16 %v886_v26, %v874_v1  ;;  %v909_v41 = vsub.f32 %v4284_v47, %v908_v24  ;;  %v637_v36 = vand.u32 4294901760, %v5056_v37  ;;  %v898_v8 = vand.u32 4294901760, %v897_v19  ;;  %3458 = vmatpush1.bf16.msra.mxu0 %v3457_v22 }
  0xb0   : > { %v623_v44 = vand.u32 4294901760, %v622_v52  ;;  %v3459_v13 = vpack.c.bf16 %v908_v24, %v896_v3  ;;  %618 = vmatprep.mubr.f32.mxu1 %v617_v60  ;;  %v632_v5 = vsub.f32 %v5051_v62, %v631_v23  ;;  %v6288_v46 = vand.u32 4294901760, %v4311_v53  ;;  %1879 = vmatprep.mubr.f32.mxu0 %v631_v23 }
  0xb1   : > { %3264 = vmatprep.subr.bf16.mxu1 %v3263_v35  ;;  %v910_v39 = vand.u32 4294901760, %v909_v41  ;;  %v6289_v40 = vand.u32 4294901760, %v4313_v54  ;;  %v638_v52 = vsub.f32 %v5056_v37, %v637_v36  ;;  %v5078_v3 = vsub.f32 %v458_v20, %v5059_v48 }
  0xb2   : > { %v903_v1 = vsub.f32 %v4311_v53, %v6288_v46  ;;  %624 = vmatmul.mubr.f32.vlgmr.msra.gmra.mrb[0].mxu1 %v623_v44  ;;  %v6290_v19 = vmov %v6288_v46  ;;  %v5080_v28 = vand.u32 4294901760, %v457_v16  ;;  %v633_v46 = vand.u32 4294901760, %v632_v5  ;;  %1883 = vmatmul.mubr.f32.gmra.mrb[2].mxu0 %v637_v36  ;;  %v460_v5 = vld [vmem:[%s4156_s29 + $0x38] sm:$0xff] }
  0xb3   : > { %v915_v26 = vsub.f32 %v4313_v54, %v6289_v40  ;;  %v6291_v60 = vmov %v6289_v40  ;;  %6292 = vst [vmem:[#allocation90_spill] sm:$0xff] %v5078_v3  ;;  %3266 = vmatpush1.bf16.msra.mxu1 %v3265_v11  ;;  %v3267_v24 = vpack.c.bf16 %v910_v39, %v898_v8  ;;  %v639_v22 = vand.u32 4294901760, %v638_v52  ;;  %3460 = vmatprep.subr.bf16.mxu0 %v3459_v13 }
  0xb4   : > { %v3461_v35 = vpack.c.bf16 %v6291_v60, %v6290_v19  ;;  %v904_v41 = vand.u32 4294901760, %v903_v1  ;;  %v647_v40 = vand.u32 4294901760, %v5078_v3  ;;  %v5084_v19 = vsub.f32 %v457_v16, %v5080_v28  ;;  %634 = vmatprep.mubr.f32.mxu1 %v633_v46 }
  0xb5   : > { %v916_v44 = vand.u32 4294901760, %v915_v26  ;;  %v920_v20 = vand.u32 4294901760, %v4325_v57  ;;  %3268 = vmatprep.subr.bf16.mxu1 %v3267_v24  ;;  %v932_v23 = vand.u32 4294901760, %v4343_v63  ;;  %v6294_v39 = vand.u32 4294901760, %v4358_v4  ;;  %v459_v24 = vld [vmem:[%s4156_s29 + $0x30] sm:$0xff] }
  0xb6   : > { %6293 = vst [vmem:[#allocation91_spill] sm:$0xff] %v5084_v19  ;;  %v6295_v36 = vand.u32 4294901760, %v4366_v6  ;;  %640 = vmatmul.mubr.f32.gmra.mrb[2].mxu1 %v639_v22  ;;  %3462 = vmatpush1.bf16.msra.mxu0 %v3461_v35  ;;  %v648_v16 = vsub.f32 %v5078_v3, %v647_v40  ;;  %v653_v1 = vand.u32 4294901760, %v5084_v19  ;;  %v5105_v37 = vand.u32 4294901760, %v460_v5 }
  0xb7   : > { %v3269_v11 = vpack.c.bf16 %v916_v44, %v904_v41  ;;  %v927_v8 = vsub.f32 %v4358_v4, %v6294_v39  ;;  %v921_v26 = vsub.f32 %v4325_v57, %v920_v20  ;;  %v6296_v52 = vmov %v6294_v39  ;;  %1891 = vmatprep.mubr.f32.mxu0 %v647_v40 }
  0xb8   : > { %v939_v13 = vsub.f32 %v4366_v6, %v6295_v36  ;;  %v6297_v60 = vmov %v6295_v36  ;;  %v933_v41 = vsub.f32 %v4343_v63, %v932_v23  ;;  %v3463_v44 = vpack.c.bf16 %v932_v23, %v920_v20  ;;  %1895 = vmatmul.mubr.f32.gmra.mrb[4].mxu0 %v653_v1  ;;  %6298 = vst [vmem:[#allocation92_spill] sm:$0xff] %v5105_v37 }
  0xb9   : > { %v3465_v46 = vpack.c.bf16 %v6297_v60, %v6296_v52  ;;  %3270 = vmatpush1.bf16.msra.mxu1 %v3269_v11  ;;  %v928_v39 = vand.u32 4294901760, %v927_v8  ;;  %v649_v35 = vand.u32 4294901760, %v648_v16  ;;  %v654_v36 = vsub.f32 %v5084_v19, %v653_v1 }
  0xba   : > { %v940_v22 = vand.u32 4294901760, %v939_v13  ;;  %v922_v3 = vand.u32 4294901760, %v921_v26  ;;  %v934_v62 = vand.u32 4294901760, %v933_v41  ;;  %3464 = vmatprep.subr.bf16.mxu0 %v3463_v44  ;;  %v5107_v60 = vand.u32 4294901760, %v459_v24 }
  0xbb   : > { %v944_v40 = vand.u32 4294901760, %v4376_v14  ;;  %650 = vmatprep.mubr.f32.mxu1 %v649_v35  ;;  %v655_v20 = vand.u32 4294901760, %v654_v36  ;;  %3466 = vmatpush1.bf16.msra.mxu0 %v3465_v46  ;;  %v5111_v11 = vsub.f32 %v460_v5, %v5105_v37  ;;  %v956_v23 = vand.u32 4294901760, %v4384_v29  ;;  %v462_v46 = vld [vmem:[%s4156_s29 + $0x48] sm:$0xff] }
  0xbc   : > { %v3273_v52 = vpack.c.bf16 %v940_v22, %v928_v39  ;;  %6299 = vst [vmem:[#allocation93_spill] sm:$0xff] %v5107_v60  ;;  %v6301_v8 = vand.u32 4294901760, %v4398_v43  ;;  %v3271_v16 = vpack.c.bf16 %v934_v62, %v922_v3  ;;  %v5118_v1 = vsub.f32 %v459_v24, %v5107_v60  ;;  %v461_v39 = vld [vmem:[%s4156_s29 + $0x40] sm:$0xff] }
  0xbd   : > { %6300 = vst [vmem:[#allocation94_spill] sm:$0xff] %v5111_v11  ;;  %v945_v26 = vsub.f32 %v4376_v14, %v944_v40  ;;  %v6303_v41 = vand.u32 4294901760, %v4402_v49  ;;  %656 = vmatmul.mubr.f32.gmra.mrb[4].mxu1 %v655_v20  ;;  %v663_v5 = vand.u32 4294901760, %v5111_v11  ;;  %v957_v22 = vsub.f32 %v4384_v29, %v956_v23 }
  0xbe   : > { %v951_v13 = vsub.f32 %v4398_v43, %v6301_v8  ;;  %6302 = vst [vmem:[#allocation95_spill] sm:$0xff] %v5118_v1  ;;  %v3467_v35 = vpack.c.bf16 %v956_v23, %v944_v40  ;;  %3272 = vmatprep.subr.bf16.mxu1 %v3271_v16  ;;  %v669_v62 = vand.u32 4294901760, %v5118_v1  ;;  %v5134_v37 = vand.u32 4294901760, %v462_v46 }
  0xbf   : > { %v963_v44 = vsub.f32 %v4402_v49, %v6303_v41  ;;  %v946_v3 = vand.u32 4294901760, %v945_v26  ;;  %v6304_v19 = vmov %v6303_v41  ;;  %3274 = vmatpush1.bf16.msra.mxu1 %v3273_v52  ;;  %v664_v41 = vsub.f32 %v5111_v11, %v663_v5  ;;  %1903 = vmatprep.mubr.f32.mxu0 %v663_v5 }
  0xc0   : > { %v952_v36 = vand.u32 4294901760, %v951_v13  ;;  %v3469_v60 = vpack.c.bf16 %v6304_v19, %v6301_v8  ;;  %v958_v20 = vand.u32 4294901760, %v957_v22  ;;  %v5136_v40 = vand.u32 4294901760, %v461_v39  ;;  %1907 = vmatmul.mubr.f32.gmra.mrb[6].mxu0 %v669_v62  ;;  %3468 = vmatprep.subr.bf16.mxu0 %v3467_v35  ;;  %v464_v22 = vld [vmem:[%s4156_s29 + $0x58] sm:$0xff] }
  0xc1   : > { %v964_v24 = vand.u32 4294901760, %v963_v44  ;;  %v670_v23 = vsub.f32 %v5118_v1, %v669_v62  ;;  %v968_v16 = vand.u32 4294901760, %v4421_v0  ;;  %v980_v26 = vand.u32 4294901760, %v4429_v2 }
  0xc2   : > { %6305 = vst [vmem:[#allocation96_spill] sm:$0xff] %v5136_v40  ;;  %v665_v19 = vand.u32 4294901760, %v664_v41  ;;  %v3275_v52 = vpack.c.bf16 %v958_v20, %v946_v3  ;;  %3470 = vmatpush1.bf16.msra.mxu0 %v3469_v60  ;;  %v5142_v44 = vsub.f32 %v462_v46, %v5134_v37  ;;  %v5145_v5 = vsub.f32 %v461_v39, %v5136_v40  ;;  %v463_v20 = vld [vmem:[%s4156_s29 + $0x50] sm:$0xff] }
  0xc3   : > { %v3277_v13 = vpack.c.bf16 %v964_v24, %v952_v36  ;;  %v671_v8 = vand.u32 4294901760, %v670_v23  ;;  %v969_v62 = vsub.f32 %v4421_v0, %v968_v16  ;;  %v981_v35 = vsub.f32 %v4429_v2, %v980_v26 }
  0xc4   : > { %6306 = vst [vmem:[#allocation97_spill] sm:$0xff] %v5142_v44  ;;  %6307 = vst [vmem:[#allocation98_spill] sm:$0xff] %v5145_v5  ;;  %v3471_v36 = vpack.c.bf16 %v980_v26, %v968_v16  ;;  %666 = vmatprep.mubr.f32.mxu1 %v665_v19  ;;  %3276 = vmatprep.subr.bf16.mxu1 %v3275_v52  ;;  %v679_v24 = vand.u32 4294901760, %v5142_v44  ;;  %v685_v3 = vand.u32 4294901760, %v5145_v5  ;;  %v6308_v60 = vand.u32 4294901760, %v4440_v12 }
  0xc5   : > { %v6309_v39 = vand.u32 4294901760, %v4442_v9  ;;  %672 = vmatmul.mubr.f32.gmra.mrb[6].mxu1 %v671_v8  ;;  %v970_v23 = vand.u32 4294901760, %v969_v62  ;;  %v982_v1 = vand.u32 4294901760, %v981_v35  ;;  %v5163_v52 = vand.u32 4294901760, %v464_v22 }
  0xc6   : > { %v975_v46 = vsub.f32 %v4440_v12, %v6308_v60  ;;  %3472 = vmatprep.subr.bf16.mxu0 %v3471_v36  ;;  %v6310_v16 = vmov %v6308_v60  ;;  %3278 = vmatpush1.bf16.msra.mxu1 %v3277_v13  ;;  %v680_v60 = vsub.f32 %v5142_v44, %v679_v24  ;;  %v686_v11 = vsub.f32 %v5145_v5, %v685_v3 }
  0xc7   : > { %v987_v41 = vsub.f32 %v4442_v9, %v6309_v39  ;;  %v6311_v26 = vmov %v6309_v39  ;;  %6312 = vst [vmem:[#allocation99_spill] sm:$0xff] %v5163_v52  ;;  %1915 = vmatprep.mubr.f32.mxu0 %v679_v24  ;;  %v3279_v8 = vpack.c.bf16 %v982_v1, %v970_v23  ;;  %v5168_v62 = vsub.f32 %v464_v22, %v5163_v52  ;;  %v484_v52 = vld [vmem:[%s4156_s29 + $0xf8] sm:$0xff] }
  0xc8   : > { %v3473_v19 = vpack.c.bf16 %v6311_v26, %v6310_v16  ;;  %v976_v39 = vand.u32 4294901760, %v975_v46  ;;  %1919 = vmatmul.mubr.f32.gmra.mrb[8].mxu0 %v685_v3  ;;  %v5170_v35 = vand.u32 4294901760, %v463_v20  ;;  %v992_v36 = vand.u32 4294901760, %v4466_v50  ;;  %v466_v16 = vld [vmem:[%s4156_s29 + $0x68] sm:$0xff] }
  0xc9   : > { %v988_v40 = vand.u32 4294901760, %v987_v41  ;;  %6313 = vst [vmem:[#allocation100_spill] sm:$0xff] %v5168_v62  ;;  %v681_v26 = vand.u32 4294901760, %v680_v60  ;;  %v687_v13 = vand.u32 4294901760, %v686_v11  ;;  %v1004_v24 = vand.u32 4294901760, %v4468_v32  ;;  %3280 = vmatprep.subr.bf16.mxu1 %v3279_v8 }
  0xca   : > { %6314 = vst [vmem:[#allocation101_spill] sm:$0xff] %v5170_v35  ;;  %3474 = vmatpush1.bf16.msra.mxu0 %v3473_v19  ;;  %v695_v46 = vand.u32 4294901760, %v5168_v62  ;;  %v5177_v1 = vsub.f32 %v463_v20, %v5170_v35  ;;  %v993_v22 = vsub.f32 %v4466_v50, %v992_v36  ;;  %v6316_v3 = vand.u32 4294901760, %v4486_v10 }
  0xcb   : > { %v3281_v9 = vpack.c.bf16 %v988_v40, %v976_v39  ;;  %682 = vmatprep.mubr.f32.mxu1 %v681_v26  ;;  %v1005_v11 = vsub.f32 %v4468_v32, %v1004_v24  ;;  %v3475_v40 = vpack.c.bf16 %v1004_v24, %v992_v36  ;;  %v6317_v23 = vand.u32 4294901760, %v4488_v55  ;;  %v465_v39 = vld [vmem:[%s4156_s29 + $0x60] sm:$0xff] }
  0xcc   : > { %6315 = vst [vmem:[#allocation102_spill] sm:$0xff] %v5177_v1  ;;  %v999_v41 = vsub.f32 %v4486_v10, %v6316_v3  ;;  %v5187_v60 = vand.u32 4294901760, %v466_v16  ;;  %688 = vmatmul.mubr.f32.gmra.mrb[8].mxu1 %v687_v13  ;;  %v696_v20 = vsub.f32 %v5168_v62, %v695_v46  ;;  %1927 = vmatprep.mubr.f32.mxu0 %v695_v46  ;;  %v701_v8 = vand.u32 4294901760, %v5177_v1  ;;  %v6403_v32 = vld [vmem:[#allocation75_spill] sm:$0xff] }
  0xcd   : > { %3282 = vmatpush1.bf16.msra.mxu1 %v3281_v9  ;;  %v1011_v19 = vsub.f32 %v4488_v55, %v6317_v23  ;;  %v994_v3 = vand.u32 4294901760, %v993_v22  ;;  %v1006_v9 = vand.u32 4294901760, %v1005_v11  ;;  %3476 = vmatprep.subr.bf16.mxu0 %v3475_v40  ;;  %v6319_v36 = vand.u32 4294901760, %v4486_v10 }
  0xce   : > { %6318 = vst [vmem:[#allocation103_spill] sm:$0xff] %v5187_v60  ;;  %v1000_v26 = vand.u32 4294901760, %v999_v41  ;;  %v6320_v24 = vmov %v6317_v23  ;;  %v5197_v44 = vsub.f32 %v466_v16, %v5187_v60  ;;  %v697_v13 = vand.u32 4294901760, %v696_v20  ;;  %1931 = vmatmul.mubr.f32.gmra.mrb[10].mxu0 %v701_v8  ;;  %v468_v41 = vld [vmem:[%s4156_s29 + $0x78] sm:$0xff] }
  0xcf   : > { %v1012_v5 = vand.u32 4294901760, %v1011_v19  ;;  %v3477_v23 = vpack.c.bf16 %v6320_v24, %v6319_v36  ;;  %v702_v35 = vsub.f32 %v5177_v1, %v701_v8  ;;  %v5200_v46 = vand.u32 4294901760, %v465_v39 }
  0xd0   : > { %6321 = vst [vmem:[#allocation104_spill] sm:$0xff] %v5197_v44  ;;  %v1016_v22 = vand.u32 4294901760, %v4496_v59  ;;  %v3283_v11 = vpack.c.bf16 %v1006_v9, %v994_v3  ;;  %v711_v19 = vand.u32 4294901760, %v5197_v44  ;;  %v1028_v36 = vand.u32 4294901760, %v4498_v45  ;;  %698 = vmatprep.mubr.f32.mxu1 %v697_v13 }
  0xd1   : > { %6322 = vst [vmem:[#allocation105_spill] sm:$0xff] %v5200_v46  ;;  %v3285_v40 = vpack.c.bf16 %v1012_v5, %v1000_v26  ;;  %3478 = vmatpush1.bf16.msra.mxu0 %v3477_v23  ;;  %v703_v16 = vand.u32 4294901760, %v702_v35  ;;  %v5207_v20 = vsub.f32 %v465_v39, %v5200_v46  ;;  %v6324_v24 = vand.u32 4294901760, %v4524_v17  ;;  %v467_v23 = vld [vmem:[%s4156_s29 + $0x70] sm:$0xff] }
  0xd2   : > { %v1017_v8 = vsub.f32 %v4496_v59, %v1016_v22  ;;  %3284 = vmatprep.subr.bf16.mxu1 %v3283_v11  ;;  %v712_v3 = vsub.f32 %v5197_v44, %v711_v19  ;;  %1939 = vmatprep.mubr.f32.mxu0 %v711_v19  ;;  %v1029_v5 = vsub.f32 %v4498_v45, %v1028_v36  ;;  %v5215_v9 = vand.u32 4294901760, %v468_v41 }
  0xd3   : > { %6323 = vst [vmem:[#allocation106_spill] sm:$0xff] %v5207_v20  ;;  %v1023_v1 = vsub.f32 %v4524_v17, %v6324_v24  ;;  %v3479_v26 = vpack.c.bf16 %v1028_v36, %v1016_v22  ;;  %704 = vmatmul.mubr.f32.gmra.mrb[10].mxu1 %v703_v16  ;;  %v717_v35 = vand.u32 4294901760, %v5207_v20  ;;  %v6326_v62 = vand.u32 4294901760, %v4526_v15 }
  0xd4   : > { %6325 = vst [vmem:[#allocation107_spill] sm:$0xff] %v5215_v9  ;;  %v1018_v39 = vand.u32 4294901760, %v1017_v8  ;;  %3286 = vmatpush1.bf16.msra.mxu1 %v3285_v40  ;;  %v713_v11 = vand.u32 4294901760, %v712_v3  ;;  %v1030_v24 = vand.u32 4294901760, %v1029_v5  ;;  %v6327_v19 = vand.u32 4294901760, %v4524_v17 }
  0xd5   : > { %v1024_v13 = vand.u32 4294901760, %v1023_v1  ;;  %v1035_v46 = vsub.f32 %v4526_v15, %v6326_v62  ;;  %3480 = vmatprep.subr.bf16.mxu0 %v3479_v26  ;;  %v6328_v22 = vmov %v6326_v62  ;;  %v5227_v44 = vsub.f32 %v468_v41, %v5215_v9  ;;  %1943 = vmatmul.mubr.f32.gmra.mrb[12].mxu0 %v717_v35  ;;  %v472_v15 = vld [vmem:[%s4156_s29 + $0x98] sm:$0xff] }
  0xd6   : > { %v3481_v36 = vpack.c.bf16 %v6328_v22, %v6327_v19  ;;  %v718_v16 = vsub.f32 %v5207_v20, %v717_v35  ;;  %v5230_v8 = vand.u32 4294901760, %v467_v23  ;;  %v1040_v62 = vand.u32 4294901760, %v4547_v33  ;;  %714 = vmatprep.mubr.f32.mxu1 %v713_v11  ;;  %v470_v20 = vld [vmem:[%s4156_s29 + $0x88] sm:$0xff]  ;;  %v469_v11 = vld [vmem:[%s4156_s29 + $0x80] sm:$0xff] }
  0xd7   : > { %6329 = vst [vmem:[#allocation108_spill] sm:$0xff] %v5227_v44  ;;  %v1036_v1 = vand.u32 4294901760, %v1035_v46  ;;  %v3287_v40 = vpack.c.bf16 %v1030_v24, %v1018_v39  ;;  %v727_v3 = vand.u32 4294901760, %v5227_v44  ;;  %v1052_v5 = vand.u32 4294901760, %v4555_v21 }
  0xd8   : > { %6330 = vst [vmem:[#allocation109_spill] sm:$0xff] %v5230_v8  ;;  %3482 = vmatpush1.bf16.msra.mxu0 %v3481_v36  ;;  %v6331_v41 = vand.u32 4294901760, %v4577_v58  ;;  %v719_v19 = vand.u32 4294901760, %v718_v16  ;;  %v5239_v46 = vsub.f32 %v467_v23, %v5230_v8  ;;  %v1041_v35 = vsub.f32 %v4547_v33, %v1040_v62 }
  0xd9   : > { %v3289_v22 = vpack.c.bf16 %v1036_v1, %v1024_v13  ;;  %3288 = vmatprep.subr.bf16.mxu1 %v3287_v40  ;;  %v728_v39 = vsub.f32 %v5227_v44, %v727_v3  ;;  %1951 = vmatprep.mubr.f32.mxu0 %v727_v3  ;;  %v1053_v24 = vsub.f32 %v4555_v21, %v1052_v5  ;;  %v6333_v1 = vand.u32 4294901760, %v4579_v27 }
  0xda   : > { %v1047_v26 = vsub.f32 %v4577_v58, %v6331_v41  ;;  %6332 = vst [vmem:[#allocation110_spill] sm:$0xff] %v5239_v46  ;;  %v3483_v36 = vpack.c.bf16 %v1052_v5, %v1040_v62  ;;  %720 = vmatmul.mubr.f32.gmra.mrb[12].mxu1 %v719_v19  ;;  %v733_v16 = vand.u32 4294901760, %v5239_v46  ;;  %v1042_v13 = vand.u32 4294901760, %v1041_v35  ;;  %v6367_v58 = vld [vmem:[#allocation56_spill] sm:$0xff] }
  0xdb   : > { %v1059_v23 = vsub.f32 %v4579_v27, %v6333_v1  ;;  %v6334_v8 = vmov %v6333_v1  ;;  %3290 = vmatpush1.bf16.msra.mxu1 %v3289_v22  ;;  %v729_v3 = vand.u32 4294901760, %v728_v39  ;;  %v1054_v44 = vand.u32 4294901760, %v1053_v24  ;;  %v478_v27 = vld [vmem:[%s4156_s29 + $0xc8] sm:$0xff] }
  0xdc   : > { %v1048_v9 = vand.u32 4294901760, %v1047_v26  ;;  %v3485_v40 = vpack.c.bf16 %v6334_v8, %v6331_v41  ;;  %3484 = vmatprep.subr.bf16.mxu0 %v3483_v36  ;;  %v5255_v62 = vand.u32 4294901760, %v470_v20  ;;  %v5257_v5 = vand.u32 4294901760, %v469_v11  ;;  %1955 = vmatmul.mubr.f32.gmra.mrb[14].mxu0 %v733_v16 }
  0xdd   : > { %v734_v26 = vsub.f32 %v5239_v46, %v733_v16  ;;  %v1060_v19 = vand.u32 4294901760, %v1059_v23  ;;  %v1064_v35 = vand.u32 4294901760, %v4589_v18  ;;  %v1076_v1 = vand.u32 4294901760, %v4597_v31  ;;  %730 = vmatprep.mubr.f32.mxu1 %v729_v3 }
  0xde   : > { %6335 = vst [vmem:[#allocation111_spill] sm:$0xff] %v5255_v62  ;;  %6336 = vst [vmem:[#allocation112_spill] sm:$0xff] %v5257_v5  ;;  %v3291_v8 = vpack.c.bf16 %v1054_v44, %v1042_v13  ;;  %3486 = vmatpush1.bf16.msra.mxu0 %v3485_v40  ;;  %v5263_v22 = vsub.f32 %v470_v20, %v5255_v62  ;;  %v5266_v39 = vsub.f32 %v469_v11, %v5257_v5  ;;  %v471_v11 = vld [vmem:[%s4156_s29 + $0x90] sm:$0xff] }
  0xdf   : > { %v5268_v24 = vand.u32 4294901760, %v472_v15  ;;  %v735_v36 = vand.u32 4294901760, %v734_v26  ;;  %v3293_v41 = vpack.c.bf16 %v1060_v19, %v1048_v9  ;;  %v1065_v16 = vsub.f32 %v4589_v18, %v1064_v35 }
  0xe0   : > { %6337 = vst [vmem:[#allocation113_spill] sm:$0xff] %v5263_v22  ;;  %6338 = vst [vmem:[#allocation114_spill] sm:$0xff] %v5266_v39  ;;  %v1077_v23 = vsub.f32 %v4597_v31, %v1076_v1  ;;  %3292 = vmatprep.subr.bf16.mxu1 %v3291_v8  ;;  %v743_v46 = vand.u32 4294901760, %v5263_v22  ;;  %v749_v44 = vand.u32 4294901760, %v5266_v39  ;;  %v3487_v13 = vpack.c.bf16 %v1076_v1, %v1064_v35 }
  0xe1   : > { %6339 = vst [vmem:[#allocation115_spill] sm:$0xff] %v5268_v24  ;;  %v6340_v20 = vand.u32 4294901760, %v4607_v7  ;;  %736 = vmatmul.mubr.f32.gmra.mrb[14].mxu1 %v735_v36  ;;  %v1066_v3 = vand.u32 4294901760, %v1065_v16  ;;  %v6341_v9 = vand.u32 4294901760, %v4623_v61  ;;  %v5288_v36 = vsub.f32 %v472_v15, %v5268_v24 }
  0xe2   : > { %v1078_v26 = vand.u32 4294901760, %v1077_v23  ;;  %3294 = vmatpush1.bf16.msra.mxu1 %v3293_v41  ;;  %v744_v35 = vsub.f32 %v5263_v22, %v743_v46  ;;  %1963 = vmatprep.mubr.f32.mxu0 %v743_v46  ;;  %v750_v1 = vsub.f32 %v5266_v39, %v749_v44 }
  0xe3   : > { %v1071_v40 = vsub.f32 %v4607_v7, %v6340_v20  ;;  %v1083_v19 = vsub.f32 %v4623_v61, %v6341_v9  ;;  %v6342_v8 = vmov %v6340_v20  ;;  %v6343_v5 = vmov %v6341_v9  ;;  %6344 = vst [vmem:[#allocation116_spill] sm:$0xff] %v5288_v36  ;;  %1967 = vmatmul.mubr.f32.gmra.mrb[16].mxu0 %v749_v44  ;;  %v474_v61 = vld [vmem:[%s4156_s29 + $0xa8] sm:$0xff] }
  0xe4   : > { %v3489_v62 = vpack.c.bf16 %v6343_v5, %v6342_v8  ;;  %v3295_v16 = vpack.c.bf16 %v1078_v26, %v1066_v3  ;;  %3488 = vmatprep.subr.bf16.mxu0 %v3487_v13  ;;  %v5290_v9 = vand.u32 4294901760, %v471_v11  ;;  %v1088_v7 = vand.u32 4294901760, %v4634_v56 }
  0xe5   : > { %v1072_v20 = vand.u32 4294901760, %v1071_v40  ;;  %v1084_v23 = vand.u32 4294901760, %v1083_v19  ;;  %v745_v5 = vand.u32 4294901760, %v744_v35  ;;  %v751_v41 = vand.u32 4294901760, %v750_v1  ;;  %v473_v1 = vld [vmem:[%s4156_s29 + $0xa0] sm:$0xff] }
  0xe6   : > { %6345 = vst [vmem:[#allocation117_spill] sm:$0xff] %v5290_v9  ;;  %3490 = vmatpush1.bf16.msra.mxu0 %v3489_v62  ;;  %v759_v46 = vand.u32 4294901760, %v5288_v36  ;;  %v1100_v40 = vand.u32 4294901760, %v4636_v42  ;;  %3296 = vmatprep.subr.bf16.mxu1 %v3295_v16  ;;  %v5297_v3 = vsub.f32 %v471_v11, %v5290_v9  ;;  %v1089_v44 = vsub.f32 %v4634_v56, %v1088_v7 }
  0xe7   : > { %v3297_v15 = vpack.c.bf16 %v1084_v23, %v1072_v20  ;;  %v6347_v13 = vand.u32 4294901760, %v4654_v25  ;;  %746 = vmatprep.mubr.f32.mxu1 %v745_v5  ;;  %v5305_v35 = vand.u32 4294901760, %v474_v61  ;;  %v6349_v23 = vld [vmem:[#allocation47_spill] sm:$0xff] }
  0xe8   : > { %6346 = vst [vmem:[#allocation118_spill] sm:$0xff] %v5297_v3  ;;  %v760_v19 = vsub.f32 %v5288_v36, %v759_v46  ;;  %1975 = vmatprep.mubr.f32.mxu0 %v759_v46  ;;  %v1101_v62 = vsub.f32 %v4636_v42, %v1100_v40  ;;  %v3491_v8 = vpack.c.bf16 %v1100_v40, %v1088_v7  ;;  %v765_v11 = vand.u32 4294901760, %v5297_v3 }
  0xe9   : > { %v1095_v26 = vsub.f32 %v4654_v25, %v6347_v13  ;;  %6348 = vst [vmem:[#allocation119_spill] sm:$0xff] %v5305_v35  ;;  %752 = vmatmul.mubr.f32.gmra.mrb[16].mxu1 %v751_v41  ;;  %v1090_v20 = vand.u32 4294901760, %v1089_v44  ;;  %v6350_v39 = vand.u32 4294901760, %v6349_v23  ;;  %v6351_v46 = vand.u32 4294901760, %v4654_v25  ;;  %v476_v25 = vld [vmem:[%s4156_s29 + $0xb8] sm:$0xff] }
  0xea   : > { %3298 = vmatpush1.bf16.msra.mxu1 %v3297_v15  ;;  %v761_v5 = vand.u32 4294901760, %v760_v19  ;;  %v1102_v13 = vand.u32 4294901760, %v1101_v62  ;;  %3492 = vmatprep.subr.bf16.mxu0 %v3491_v8  ;;  %v5317_v36 = vsub.f32 %v474_v61, %v5305_v35  ;;  %v766_v41 = vsub.f32 %v5297_v3, %v765_v11  ;;  %v6356_v8 = vld [vmem:[#allocation51_spill] sm:$0xff] }
  0xeb   : > { %v1096_v16 = vand.u32 4294901760, %v1095_v26  ;;  %v1107_v22 = vsub.f32 %v6349_v23, %v6350_v39  ;;  %v6352_v7 = vmov %v6350_v39  ;;  %1979 = vmatmul.mubr.f32.gmra.mrb[18].mxu0 %v765_v11  ;;  %v5320_v26 = vand.u32 4294901760, %v473_v1  ;;  %v6355_v39 = vld [vmem:[#allocation49_spill] sm:$0xff] }
  0xec   : > { %v3493_v40 = vpack.c.bf16 %v6352_v7, %v6351_v46  ;;  %6353 = vst [vmem:[#allocation120_spill] sm:$0xff] %v5317_v36  ;;  %v1112_v15 = vand.u32 4294901760, %v6355_v39  ;;  %762 = vmatprep.mubr.f32.mxu1 %v761_v5  ;;  %v3299_v19 = vpack.c.bf16 %v1102_v13, %v1090_v20  ;;  %v775_v62 = vand.u32 4294901760, %v5317_v36  ;;  %v6357_v7 = vld [vmem:[#allocation52_spill] sm:$0xff]  ;;  %v475_v5 = vld [vmem:[%s4156_s29 + $0xb0] sm:$0xff] }
  0xed   : > { %v1108_v44 = vand.u32 4294901760, %v1107_v22  ;;  %6354 = vst [vmem:[#allocation121_spill] sm:$0xff] %v5320_v26  ;;  %v1124_v46 = vand.u32 4294901760, %v6356_v8  ;;  %v6358_v61 = vand.u32 4294901760, %v6357_v7  ;;  %v767_v23 = vand.u32 4294901760, %v766_v41 }
  0xee   : > { %3494 = vmatpush1.bf16.msra.mxu0 %v3493_v40  ;;  %v5329_v22 = vsub.f32 %v473_v1, %v5320_v26  ;;  %v1113_v11 = vsub.f32 %v6355_v39, %v1112_v15  ;;  %3300 = vmatprep.subr.bf16.mxu1 %v3299_v19  ;;  %v776_v20 = vsub.f32 %v5317_v36, %v775_v62  ;;  %v6362_v26 = vand.u32 4294901760, %v6357_v7 }
  0xef   : > { %v1119_v35 = vsub.f32 %v6357_v7, %v6358_v61  ;;  %v3301_v3 = vpack.c.bf16 %v1108_v44, %v1096_v16  ;;  %1987 = vmatprep.mubr.f32.mxu0 %v775_v62  ;;  %v1125_v13 = vsub.f32 %v6356_v8, %v1124_v46  ;;  %v3495_v40 = vpack.c.bf16 %v1124_v46, %v1112_v15  ;;  %v6360_v44 = vld [vmem:[#allocation53_spill] sm:$0xff] }
  0xf0   : > { %6359 = vst [vmem:[#allocation49_spill] sm:$0xff] %v5329_v22  ;;  %768 = vmatmul.mubr.f32.gmra.mrb[18].mxu1 %v767_v23  ;;  %v781_v41 = vand.u32 4294901760, %v5329_v22  ;;  %v1114_v16 = vand.u32 4294901760, %v1113_v11  ;;  %v6361_v61 = vand.u32 4294901760, %v6360_v44  ;;  %v777_v62 = vand.u32 4294901760, %v776_v20  ;;  %v6366_v11 = vld [vmem:[#allocation55_spill] sm:$0xff] }
  0xf1   : > { %v1120_v9 = vand.u32 4294901760, %v1119_v35  ;;  %3302 = vmatpush1.bf16.msra.mxu1 %v3301_v3  ;;  %v1126_v36 = vand.u32 4294901760, %v1125_v13  ;;  %3496 = vmatprep.subr.bf16.mxu0 %v3495_v40  ;;  %v5345_v15 = vand.u32 4294901760, %v476_v25  ;;  %v5347_v35 = vand.u32 4294901760, %v475_v5 }
  0xf2   : > { %v1131_v1 = vsub.f32 %v6360_v44, %v6361_v61  ;;  %v6363_v24 = vmov %v6361_v61  ;;  %v782_v23 = vsub.f32 %v5329_v22, %v781_v41  ;;  %1991 = vmatmul.mubr.f32.gmra.mrb[20].mxu0 %v781_v41  ;;  %v1136_v61 = vand.u32 4294901760, %v6366_v11  ;;  %778 = vmatprep.mubr.f32.mxu1 %v777_v62 }
  0xf3   : > { %v3497_v19 = vpack.c.bf16 %v6363_v24, %v6362_v26  ;;  %6364 = vst [vmem:[#allocation51_spill] sm:$0xff] %v5345_v15  ;;  %6365 = vst [vmem:[#allocation122_spill] sm:$0xff] %v5347_v35  ;;  %v1148_v7 = vand.u32 4294901760, %v6367_v58  ;;  %v3303_v24 = vpack.c.bf16 %v1126_v36, %v1114_v16  ;;  %v5353_v3 = vsub.f32 %v476_v25, %v5345_v15 }
  0xf4   : > { %v1132_v46 = vand.u32 4294901760, %v1131_v1  ;;  %v5356_v26 = vsub.f32 %v475_v5, %v5347_v35  ;;  %v5358_v20 = vand.u32 4294901760, %v478_v27  ;;  %v783_v13 = vand.u32 4294901760, %v782_v23  ;;  %v477_v5 = vld [vmem:[%s4156_s29 + $0xc0] sm:$0xff] }
  0xf5   : > { %3498 = vmatpush1.bf16.msra.mxu0 %v3497_v19  ;;  %6368 = vst [vmem:[#allocation55_spill] sm:$0xff] %v5353_v3  ;;  %v1137_v41 = vsub.f32 %v6366_v11, %v1136_v61  ;;  %v1149_v1 = vsub.f32 %v6367_v58, %v1148_v7  ;;  %3304 = vmatprep.subr.bf16.mxu1 %v3303_v24  ;;  %v791_v22 = vand.u32 4294901760, %v5353_v3  ;;  %v6371_v19 = vld [vmem:[#allocation58_spill] sm:$0xff] }
  0xf6   : > { %6369 = vst [vmem:[#allocation56_spill] sm:$0xff] %v5356_v26  ;;  %6370 = vst [vmem:[#allocation123_spill] sm:$0xff] %v5358_v20  ;;  %v3305_v40 = vpack.c.bf16 %v1132_v46, %v1120_v9  ;;  %v797_v36 = vand.u32 4294901760, %v5356_v26  ;;  %v3499_v16 = vpack.c.bf16 %v1148_v7, %v1136_v61  ;;  %v6372_v25 = vand.u32 4294901760, %v6371_v19  ;;  %784 = vmatmul.mubr.f32.gmra.mrb[20].mxu1 %v783_v13  ;;  %v6373_v9 = vld [vmem:[#allocation59_spill] sm:$0xff] }
  0xf7   : > { %v1138_v35 = vand.u32 4294901760, %v1137_v41  ;;  %v1150_v23 = vand.u32 4294901760, %v1149_v1  ;;  %v6374_v46 = vand.u32 4294901760, %v6373_v9  ;;  %v792_v7 = vsub.f32 %v5353_v3, %v791_v22  ;;  %1999 = vmatprep.mubr.f32.mxu0 %v791_v22  ;;  %v6385_v3 = vld [vmem:[#allocation65_spill] sm:$0xff] }
  0xf8   : > { %v1143_v62 = vsub.f32 %v6371_v19, %v6372_v25  ;;  %v6375_v24 = vmov %v6372_v25  ;;  %3306 = vmatpush1.bf16.msra.mxu1 %v3305_v40  ;;  %v798_v61 = vsub.f32 %v5356_v26, %v797_v36  ;;  %v5378_v13 = vsub.f32 %v478_v27, %v5358_v20  ;;  %2003 = vmatmul.mubr.f32.gmra.mrb[22].mxu0 %v797_v36  ;;  %v6379_v19 = vld [vmem:[#allocation62_spill] sm:$0xff]  ;;  %v6382_v36 = vld [vmem:[#allocation64_spill] sm:$0xff] }
  0xf9   : > { %v1155_v15 = vsub.f32 %v6373_v9, %v6374_v46  ;;  %v6376_v44 = vmov %v6374_v46  ;;  %v3307_v41 = vpack.c.bf16 %v1150_v23, %v1138_v35  ;;  %3500 = vmatprep.subr.bf16.mxu0 %v3499_v16  ;;  %v5380_v46 = vand.u32 4294901760, %v477_v5  ;;  %v480_v9 = vld [vmem:[%s4156_s29 + $0xd8] sm:$0xff] }
  0xfa   : > { %v3501_v17 = vpack.c.bf16 %v6376_v44, %v6375_v24  ;;  %v1144_v25 = vand.u32 4294901760, %v1143_v62  ;;  %6377 = vst [vmem:[#allocation124_spill] sm:$0xff] %v5378_v13  ;;  %v1160_v60 = vand.u32 4294901760, %v6379_v19  ;;  %v793_v44 = vand.u32 4294901760, %v792_v7  ;;  %v6380_v24 = vld [vmem:[#allocation63_spill] sm:$0xff] }
  0xfb   : > { %v1156_v1 = vand.u32 4294901760, %v1155_v15  ;;  %6378 = vst [vmem:[#allocation125_spill] sm:$0xff] %v5380_v46  ;;  %v799_v40 = vand.u32 4294901760, %v798_v61  ;;  %v807_v22 = vand.u32 4294901760, %v5378_v13  ;;  %v1172_v62 = vand.u32 4294901760, %v6380_v24  ;;  %3308 = vmatprep.subr.bf16.mxu1 %v3307_v41  ;;  %v479_v41 = vld [vmem:[%s4156_s29 + $0xd0] sm:$0xff] }
  0xfc   : > { %3502 = vmatpush1.bf16.msra.mxu0 %v3501_v17  ;;  %v5387_v35 = vsub.f32 %v477_v5, %v5380_v46  ;;  %v1161_v15 = vsub.f32 %v6379_v19, %v1160_v60  ;;  %v6383_v16 = vand.u32 4294901760, %v6382_v36  ;;  %794 = vmatprep.mubr.f32.mxu1 %v793_v44  ;;  %v5395_v26 = vand.u32 4294901760, %v480_v9 }
  0xfd   : > { %v3309_v27 = vpack.c.bf16 %v1156_v1, %v1144_v25  ;;  %v808_v7 = vsub.f32 %v5378_v13, %v807_v22  ;;  %2011 = vmatprep.mubr.f32.mxu0 %v807_v22  ;;  %v1173_v17 = vsub.f32 %v6380_v24, %v1172_v62  ;;  %v3503_v61 = vpack.c.bf16 %v1172_v62, %v1160_v60 }
  0xfe   : > { %6381 = vst [vmem:[#allocation62_spill] sm:$0xff] %v5387_v35  ;;  %v1167_v23 = vsub.f32 %v6382_v36, %v6383_v16  ;;  %6384 = vst [vmem:[#allocation63_spill] sm:$0xff] %v5395_v26  ;;  %800 = vmatmul.mubr.f32.gmra.mrb[22].mxu1 %v799_v40  ;;  %v813_v5 = vand.u32 4294901760, %v5387_v35  ;;  %v1162_v25 = vand.u32 4294901760, %v1161_v15  ;;  %v6386_v46 = vand.u32 4294901760, %v6385_v3 }
  0xff   : > { %3310 = vmatpush1.bf16.msra.mxu1 %v3309_v27  ;;  %v809_v44 = vand.u32 4294901760, %v808_v7  ;;  %v1174_v16 = vand.u32 4294901760, %v1173_v17  ;;  %3504 = vmatprep.subr.bf16.mxu0 %v3503_v61  ;;  %v6387_v22 = vand.u32 4294901760, %v6382_v36  ;;  %v5407_v13 = vsub.f32 %v480_v9, %v5395_v26  ;;  %v6392_v61 = vld [vmem:[#allocation69_spill] sm:$0xff]  ;;  %v482_v36 = vld [vmem:[%s4156_s29 + $0xe8] sm:$0xff] }
 0x100   : > { %v1168_v1 = vand.u32 4294901760, %v1167_v23  ;;  %v1179_v20 = vsub.f32 %v6385_v3, %v6386_v46  ;;  %v6388_v60 = vmov %v6386_v46  ;;  %v814_v40 = vsub.f32 %v5387_v35, %v813_v5  ;;  %2015 = vmatmul.mubr.f32.gmra.mrb[24].mxu0 %v813_v5  ;;  %v6391_v46 = vld [vmem:[#allocation67_spill] sm:$0xff] }
 0x101   : > { %v3505_v62 = vpack.c.bf16 %v6388_v60, %v6387_v22  ;;  %6389 = vst [vmem:[#allocation126_spill] sm:$0xff] %v5407_v13  ;;  %v5410_v23 = vand.u32 4294901760, %v479_v41  ;;  %v1184_v27 = vand.u32 4294901760, %v6391_v46  ;;  %810 = vmatprep.mubr.f32.mxu1 %v809_v44  ;;  %v3311_v7 = vpack.c.bf16 %v1174_v16, %v1162_v25  ;;  %v6393_v60 = vld [vmem:[#allocation70_spill] sm:$0xff]  ;;  %v481_v44 = vld [vmem:[%s4156_s29 + $0xe0] sm:$0xff] }
 0x102   : > { %v1180_v15 = vand.u32 4294901760, %v1179_v20  ;;  %v823_v17 = vand.u32 4294901760, %v5407_v13  ;;  %v1196_v22 = vand.u32 4294901760, %v6392_v61  ;;  %v6394_v9 = vand.u32 4294901760, %v6393_v60 }
 0x103   : > { %6390 = vst [vmem:[#allocation127_spill] sm:$0xff] %v5410_v23  ;;  %3506 = vmatpush1.bf16.msra.mxu0 %v3505_v62  ;;  %v815_v3 = vand.u32 4294901760, %v814_v40  ;;  %v5419_v20 = vsub.f32 %v479_v41, %v5410_v23  ;;  %v1185_v5 = vsub.f32 %v6391_v46, %v1184_v27  ;;  %3312 = vmatprep.subr.bf16.mxu1 %v3311_v7  ;;  %v6398_v23 = vand.u32 4294901760, %v6393_v60 }
 0x104   : > { %v1191_v26 = vsub.f32 %v6393_v60, %v6394_v9  ;;  %v3313_v35 = vpack.c.bf16 %v1180_v15, %v1168_v1  ;;  %v824_v25 = vsub.f32 %v5407_v13, %v823_v17  ;;  %2023 = vmatprep.mubr.f32.mxu0 %v823_v17  ;;  %v1197_v16 = vsub.f32 %v6392_v61, %v1196_v22  ;;  %v6396_v15 = vld [vmem:[#allocation71_spill] sm:$0xff] }
 0x105   : > { %6395 = vst [vmem:[#allocation67_spill] sm:$0xff] %v5419_v20  ;;  %v3507_v62 = vpack.c.bf16 %v1196_v22, %v1184_v27  ;;  %816 = vmatmul.mubr.f32.gmra.mrb[24].mxu1 %v815_v3  ;;  %v829_v40 = vand.u32 4294901760, %v5419_v20  ;;  %v1186_v1 = vand.u32 4294901760, %v1185_v5  ;;  %v6397_v9 = vand.u32 4294901760, %v6396_v15  ;;  %v6402_v5 = vld [vmem:[#allocation73_spill] sm:$0xff] }
 0x106   : > { %v1192_v55 = vand.u32 4294901760, %v1191_v26  ;;  %3314 = vmatpush1.bf16.msra.mxu1 %v3313_v35  ;;  %v825_v17 = vand.u32 4294901760, %v824_v25  ;;  %v1198_v13 = vand.u32 4294901760, %v1197_v16  ;;  %v5435_v27 = vand.u32 4294901760, %v482_v36 }
 0x107   : > { %v1203_v41 = vsub.f32 %v6396_v15, %v6397_v9  ;;  %v6399_v10 = vmov %v6397_v9  ;;  %3508 = vmatprep.subr.bf16.mxu0 %v3507_v62  ;;  %v5437_v3 = vand.u32 4294901760, %v481_v44  ;;  %v830_v26 = vsub.f32 %v5419_v20, %v829_v40  ;;  %2027 = vmatmul.mubr.f32.gmra.mrb[26].mxu0 %v829_v40 }
 0x108   : > { %v3509_v7 = vpack.c.bf16 %v6399_v10, %v6398_v23  ;;  %6400 = vst [vmem:[#allocation69_spill] sm:$0xff] %v5435_v27  ;;  %v1208_v9 = vand.u32 4294901760, %v6402_v5  ;;  %v1220_v60 = vand.u32 4294901760, %v6403_v32  ;;  %826 = vmatprep.mubr.f32.mxu1 %v825_v17  ;;  %v3315_v10 = vpack.c.bf16 %v1198_v13, %v1186_v1 }
 0x109   : > { %6401 = vst [vmem:[#allocation128_spill] sm:$0xff] %v5437_v3  ;;  %v1204_v22 = vand.u32 4294901760, %v1203_v41  ;;  %v5443_v35 = vsub.f32 %v482_v36, %v5435_v27  ;;  %v5446_v23 = vsub.f32 %v481_v44, %v5437_v3  ;;  %v5448_v25 = vand.u32 4294901760, %v484_v52  ;;  %v483_v44 = vld [vmem:[%s4156_s29 + $0xf0] sm:$0xff] }
 0x10a   : > { %3510 = vmatpush1.bf16.msra.mxu0 %v3509_v7  ;;  %v831_v16 = vand.u32 4294901760, %v830_v26  ;;  %v1209_v40 = vsub.f32 %v6402_v5, %v1208_v9  ;;  %v1221_v41 = vsub.f32 %v6403_v32, %v1220_v60  ;;  %3316 = vmatprep.subr.bf16.mxu1 %v3315_v10  ;;  %v3511_v1 = vpack.c.bf16 %v1220_v60, %v1208_v9  ;;  %v6405_v7 = vld [vmem:[#allocation76_spill] sm:$0xff]  ;;  %v6407_v26 = vld [vmem:[#allocation77_spill] sm:$0xff] }
 0x10b   : > { %6404 = vst [vmem:[#allocation73_spill] sm:$0xff] %v5446_v23  ;;  %v3317_v62 = vpack.c.bf16 %v1204_v22, %v1192_v55  ;;  %v839_v20 = vand.u32 4294901760, %v5443_v35  ;;  %v845_v13 = vand.u32 4294901760, %v5446_v23  ;;  %v6406_v36 = vand.u32 4294901760, %v6405_v7 }
 0x10c   : > { %832 = vmatmul.mubr.f32.gmra.mrb[26].mxu1 %v831_v16  ;;  %v1210_v3 = vand.u32 4294901760, %v1209_v40  ;;  %v1222_v27 = vand.u32 4294901760, %v1221_v41  ;;  %v6408_v55 = vand.u32 4294901760, %v6407_v26  ;;  %v5468_v16 = vsub.f32 %v484_v52, %v5448_v25  ;;  %3512 = vmatprep.subr.bf16.mxu0 %v3511_v1 }
 0x10d   : > { %v1215_v17 = vsub.f32 %v6405_v7, %v6406_v36  ;;  %v6409_v15 = vmov %v6406_v36  ;;  %3318 = vmatpush1.bf16.msra.mxu1 %v3317_v62  ;;  %v840_v60 = vsub.f32 %v5443_v35, %v839_v20  ;;  %2035 = vmatprep.mubr.f32.mxu0 %v839_v20  ;;  %v846_v9 = vsub.f32 %v5446_v23, %v845_v13  ;;  %v6411_v7 = vld [vmem:[#allocation79_spill] sm:$0xff]  ;;  %v6412_v20 = vld [vmem:[#allocation80_spill] sm:$0xff] }
 0x10e   : > { %v1227_v22 = vsub.f32 %v6407_v26, %v6408_v55  ;;  %v6410_v10 = vmov %v6408_v55  ;;  %v3319_v40 = vpack.c.bf16 %v1222_v27, %v1210_v3  ;;  %2039 = vmatmul.mubr.f32.gmra.mrb[28].mxu0 %v845_v13  ;;  %v5470_v55 = vand.u32 4294901760, %v483_v44 }
 0x10f   : > { %v3513_v50 = vpack.c.bf16 %v6410_v10, %v6409_v15  ;;  %v1216_v36 = vand.u32 4294901760, %v1215_v17  ;;  %v1232_v12 = vand.u32 4294901760, %v6411_v7  ;;  %v841_v26 = vand.u32 4294901760, %v840_v60 }
 0x110   : > { %v1228_v41 = vand.u32 4294901760, %v1227_v22  ;;  %v847_v15 = vand.u32 4294901760, %v846_v9  ;;  %v855_v62 = vand.u32 4294901760, %v5468_v16  ;;  %v1244_v10 = vand.u32 4294901760, %v6412_v20  ;;  %3320 = vmatprep.subr.bf16.mxu1 %v3319_v40 }
 0x111   : > { %3514 = vmatpush1.bf16.msra.mxu0 %v3513_v50  ;;  %v5476_v52 = vsub.f32 %v483_v44, %v5470_v55  ;;  %v1233_v27 = vsub.f32 %v6411_v7, %v1232_v12  ;;  %v6413_v3 = vand.u32 4294901760, %v4987_v30  ;;  %842 = vmatprep.mubr.f32.mxu1 %v841_v26  ;;  %v6414_v44 = vand.u32 4294901760, %v4989_v51 }
 0x112   : > { %v3321_v17 = vpack.c.bf16 %v1228_v41, %v1216_v36  ;;  %v856_v1 = vsub.f32 %v5468_v16, %v855_v62  ;;  %2047 = vmatprep.mubr.f32.mxu0 %v855_v62  ;;  %v1245_v50 = vsub.f32 %v6412_v20, %v1244_v10  ;;  %v3515_v22 = vpack.c.bf16 %v1244_v10, %v1232_v12 }
 0x113   : > { %v1239_v13 = vsub.f32 %v4987_v30, %v6413_v3  ;;  %848 = vmatmul.mubr.f32.gmra.mrb[28].mxu1 %v847_v15  ;;  %v861_v60 = vand.u32 4294901760, %v5476_v52  ;;  %v1234_v9 = vand.u32 4294901760, %v1233_v27  ;;  %v1251_v40 = vsub.f32 %v4989_v51, %v6414_v44 }
 0x114   : > { %3322 = vmatpush1.bf16.msra.mxu1 %v3321_v17  ;;  %v857_v41 = vand.u32 4294901760, %v856_v1  ;;  %v1246_v23 = vand.u32 4294901760, %v1245_v50  ;;  %3516 = vmatprep.subr.bf16.mxu0 %v3515_v22  ;;  %v6415_v26 = vmov %v6413_v3  ;;  %v6416_v62 = vmov %v6414_v44  ;;  %v6417_v17 = vld [vmem:[#allocation12_spill] sm:$0xff]  ;;  %v6420_v44 = vld [vmem:[#allocation82_spill] sm:$0xff] }
 0x115   : > { %v1240_v36 = vand.u32 4294901760, %v1239_v13  ;;  %v3517_v3 = vpack.c.bf16 %v6416_v62, %v6415_v26  ;;  %v862_v12 = vsub.f32 %v5476_v52, %v861_v60  ;;  %2051 = vmatmul.mubr.f32.gmra.mrb[30].mxu0 %v861_v60  ;;  %v1252_v15 = vand.u32 4294901760, %v1251_v40  ;;  %v6424_v26 = vld [vmem:[#allocation17_spill] sm:$0xff] }
 0x116   : > { %858 = vmatprep.mubr.f32.mxu1 %v857_v41  ;;  %v3323_v10 = vpack.c.bf16 %v1246_v23, %v1234_v9  ;;  %2314 = vmatprep.mubr.f32.mxu0 %v4985_v38  ;;  %v3327_v1 = vpack.c.bf16 %v6417_v17, %v4241_v34  ;;  %v6418_v50 = vmov 1.0|1.0   ;;  %v3351_v60 = vpack.c.bf16 %v4498_v45, %v4496_v59  ;;  %v6421_v23 = vld [vmem:[#allocation14_spill] sm:$0xff]  ;;  %v6422_v9 = vld [vmem:[#allocation15_spill] sm:$0xff]  ;;  %v6431_v41 = vld [vmem:[#allocation92_spill] sm:$0xff] }
 0x117   : > { %3518 = vmatpush1.bf16.msra.mxu0 %v3517_v3  ;;  %v863_v27 = vand.u32 4294901760, %v862_v12  ;;  %v3325_v13 = vpack.c.bf16 %v1252_v15, %v1240_v36  ;;  %v3329_v36 = vpack.c.bf16 %v6422_v9, %v6421_v23  ;;  %v3355_v34 = vpack.c.bf16 %v4555_v21, %v4547_v33  ;;  %v6425_v12 = vld [vmem:[#allocation86_spill] sm:$0xff]  ;;  %v6437_v15 = vld [vmem:[#allocation96_spill] sm:$0xff] }
 0x118   : > { %3520 = vmatprep.subr.msk.bf16.mxu0 %vm4232_vm4, %v6418_v50  ;;  %3324 = vmatprep.subr.bf16.mxu1 %v3323_v10  ;;  %v3359_v40 = vpack.c.bf16 %v4597_v31, %v4589_v18  ;;  %v3331_v62 = vpack.c.bf16 %v4284_v47, %v6424_v26  ;;  %v3363_v3 = vpack.c.bf16 %v4636_v42, %v4634_v56  ;;  %v6440_v23 = vld [vmem:[#allocation24_spill] sm:$0xff]  ;;  %v6481_v31 = vld [vmem:[#allocation47_spill] sm:$0xff]  ;;  %v6489_v56 = vld [vmem:[#allocation53_spill] sm:$0xff] }
 0x119   : > { %864 = vmatmul.mubr.f32.gmra.mrb[30].mxu1 %v863_v27  ;;  %v3367_v10 = vpack.c.bf16 %v6356_v8, %v6355_v39  ;;  %v3371_v27 = vpack.c.bf16 %v6367_v58, %v6366_v11  ;;  %v3375_v47 = vpack.c.bf16 %v6380_v24, %v6379_v19  ;;  %v3333_v17 = vpack.c.bf16 %v4313_v54, %v4311_v53  ;;  %v6444_v53 = vld [vmem:[#allocation99_spill] sm:$0xff]  ;;  %v6449_v26 = vld [vmem:[#allocation32_spill] sm:$0xff]  ;;  %v6504_v58 = vld [vmem:[#allocation65_spill] sm:$0xff] }
 0x11a   : > { %2316 = vmatmul.mubr.f32.vlgmr.msra.gmra.mrb[0].mxu0 %v6420_v44  ;;  %3326 = vmatpush1.bf16.msra.mxu1 %v3325_v13  ;;  %v6427_v13 = vld [vmem:[#allocation87_spill] sm:$0xff]  ;;  %v3383_v22 = vpack.c.bf16 %v6403_v32, %v6402_v5  ;;  %v3335_v9 = vpack.c.bf16 %v4343_v63, %v4325_v57  ;;  %v3337_v54 = vpack.c.bf16 %v4366_v6, %v4358_v4  ;;  %v6447_v57 = vld [vmem:[#allocation101_spill] sm:$0xff]  ;;  %v6450_v6 = vld [vmem:[#allocation30_spill] sm:$0xff] }
 0x11b   : > { %1255 = vmatprep.mubr.f32.mxu1 %v4985_v38  ;;  %3328 = vmatprep.subr.bf16.mxu1 %v3327_v1  ;;  %v3379_v1 = vpack.c.bf16 %v6392_v61, %v6391_v46  ;;  %v3339_v63 = vpack.c.bf16 %v4384_v29, %v4376_v14  ;;  %v3341_v4 = vpack.c.bf16 %v4402_v49, %v4398_v43  ;;  %v6435_v29 = vld [vmem:[#allocation23_spill] sm:$0xff]  ;;  %v6438_v43 = vld [vmem:[#allocation25_spill] sm:$0xff]  ;;  %v6439_v49 = vld [vmem:[#allocation26_spill] sm:$0xff] }
 0x11c   : > { %3522 = vmatpush1.bf16.msk.msra.mxu0 %vm4248_vm5, %v6418_v50  ;;  %2322 = vmatprep.mubr.f32.mxu0 %v6425_v12  ;;  %v3343_v14 = vpack.c.bf16 %v4429_v2, %v4421_v0  ;;  %vm6436_vm4 = vnez %v6435_v29  ;;  %vm6441_vm5 = vnez %v6440_v23  ;;  %v6442_v0 = vld [vmem:[#allocation28_spill] sm:$0xff]  ;;  %v6443_v2 = vld [vmem:[#allocation29_spill] sm:$0xff]  ;;  %v6497_v39 = vld [vmem:[#allocation59_spill] sm:$0xff]  ;;  %v3389_v32 = vpack.c.bf16 %v4989_v51, %v4987_v30 }
 0x11d   : > { %3524 = vmatprep.subr.msk.bf16.mxu0 %vm4273_vm8, %v6418_v50  ;;  %1257 = vmatmul.mubr.f32.vlgmr.msra.gmra.mrb[0].mxu1 %v6420_v44  ;;  %v6453_v29 = vld [vmem:[#allocation33_spill] sm:$0xff]  ;;  %v6465_v45 = vld [vmem:[#allocation40_spill] sm:$0xff]  ;;  %v6512_v19 = vld [vmem:[#allocation71_spill] sm:$0xff] }
 0x11e   : > { %2324 = vmatmul.mubr.f32.gmra.mrb[2].mxu0 %v6427_v13  ;;  %3330 = vmatpush1.bf16.msra.mxu1 %v3329_v36  ;;  %v3387_v36 = vpack.c.bf16 %v6412_v20, %v6411_v7  ;;  %v6473_v33 = vld [vmem:[#allocation44_spill] sm:$0xff]  ;;  %v6520_v46 = vld [vmem:[#allocation77_spill] sm:$0xff]  ;;  %v6529_v20 = vld [vmem:[#allocation91_spill] sm:$0xff] }
 0x11f   : > { %1263 = vmatprep.mubr.f32.mxu1 %v6425_v12  ;;  %3332 = vmatprep.subr.bf16.mxu1 %v3331_v62  ;;  %v6433_v62 = vld [vmem:[#allocation93_spill] sm:$0xff]  ;;  %v6526_v30 = vld [vmem:[#allocation88_spill] sm:$0xff] }
 0x120   : > { %3526 = vmatpush1.bf16.msk.msra.mxu0 %vm4297_vm11, %v6418_v50  ;;  %2330 = vmatprep.mubr.f32.mxu0 %v5059_v48  ;;  %vm6451_vm11 = vnez %v6450_v6  ;;  %v6471_v6 = vld [vmem:[#allocation112_spill] sm:$0xff]  ;;  %v6525_v51 = vld [vmem:[#allocation85_spill] sm:$0xff] }
 0x121   : > { %3528 = vmatprep.subr.msk.bf16.mxu0 %vm4336_vm15, %v6418_v50  ;;  %1265 = vmatmul.mubr.f32.gmra.mrb[2].mxu1 %v6427_v13  ;;  %vm6454_vm15 = vnez %v6453_v29  ;;  %v6472_v29 = vld [vmem:[#allocation42_spill] sm:$0xff]  ;;  %v6527_v7 = vld [vmem:[#allocation89_spill] sm:$0xff] }
 0x122   : > { %2332 = vmatmul.mubr.f32.gmra.mrb[4].mxu0 %v5080_v28  ;;  %3334 = vmatpush1.bf16.msra.mxu1 %v3333_v17  ;;  %v3345_v17 = vpack.c.bf16 %v6439_v49, %v6438_v43  ;;  %v6455_v43 = vld [vmem:[#allocation105_spill] sm:$0xff]  ;;  %v6456_v49 = vld [vmem:[#allocation35_spill] sm:$0xff]  ;;  %v3361_v21 = vpack.c.bf16 %v6473_v33, %v6472_v29  ;;  %v6495_v29 = vld [vmem:[#allocation122_spill] sm:$0xff] }
 0x123   : > { %1271 = vmatprep.mubr.f32.mxu1 %v5059_v48  ;;  %3336 = vmatprep.subr.bf16.mxu1 %v3335_v9  ;;  %v3347_v9 = vpack.c.bf16 %v6443_v2, %v6442_v0  ;;  %v6458_v0 = vld [vmem:[#allocation34_spill] sm:$0xff]  ;;  %v6460_v2 = vld [vmem:[#allocation107_spill] sm:$0xff] }
 0x124   : > { %3530 = vmatpush1.bf16.msk.msra.mxu0 %vm4354_vm2, %v6418_v50  ;;  %2338 = vmatprep.mubr.f32.mxu0 %v6431_v41  ;;  %vm6459_vm2 = vnez %v6458_v0  ;;  %v6480_v0 = vld [vmem:[#allocation46_spill] sm:$0xff] }
 0x125   : > { %3532 = vmatprep.subr.msk.bf16.mxu0 %vm4372_vm6, %v6418_v50  ;;  %1273 = vmatmul.mubr.f32.gmra.mrb[4].mxu1 %v5080_v28  ;;  %v3365_v18 = vpack.c.bf16 %v6481_v31, %v6480_v0  ;;  %v6496_v33 = vld [vmem:[#allocation58_spill] sm:$0xff]  ;;  %v6503_v0 = vld [vmem:[#allocation64_spill] sm:$0xff]  ;;  %v6507_v31 = vld [vmem:[#allocation63_spill] sm:$0xff] }
 0x126   : > { %2340 = vmatmul.mubr.f32.gmra.mrb[6].mxu0 %v6433_v62  ;;  %3338 = vmatpush1.bf16.msra.mxu1 %v3337_v54  ;;  %v6445_v54 = vld [vmem:[#allocation27_spill] sm:$0xff]  ;;  %v3373_v8 = vpack.c.bf16 %v6497_v39, %v6496_v33  ;;  %v3377_v11 = vpack.c.bf16 %v6504_v58, %v6503_v0 }
 0x127   : > { %1279 = vmatprep.mubr.f32.mxu1 %v6431_v41  ;;  %3340 = vmatprep.subr.bf16.mxu1 %v3339_v63  ;;  %vm6446_vm8 = vnez %v6445_v54  ;;  %v6448_v63 = vld [vmem:[#allocation31_spill] sm:$0xff]  ;;  %v6463_v54 = vld [vmem:[#allocation109_spill] sm:$0xff] }
 0x128   : > { %3534 = vmatpush1.bf16.msk.msra.mxu0 %vm4394_vm10, %v6418_v50  ;;  %2346 = vmatprep.mubr.f32.mxu0 %v5134_v37 }
 0x129   : > { %3536 = vmatprep.subr.msk.bf16.mxu0 %vm6436_vm4, %v6418_v50  ;;  %1281 = vmatmul.mubr.f32.gmra.mrb[6].mxu1 %v6433_v62 }
 0x12a   : > { %2348 = vmatmul.mubr.f32.gmra.mrb[8].mxu0 %v6437_v15  ;;  %3342 = vmatpush1.bf16.msra.mxu1 %v3341_v4  ;;  %v3349_v4 = vpack.c.bf16 %v6449_v26, %v6448_v63  ;;  %v6464_v63 = vld [vmem:[#allocation39_spill] sm:$0xff] }
 0x12b   : > { %1287 = vmatprep.mubr.f32.mxu1 %v5134_v37  ;;  %3344 = vmatprep.subr.bf16.mxu1 %v3343_v14  ;;  %v6452_v14 = vld [vmem:[#allocation103_spill] sm:$0xff]  ;;  %v3357_v59 = vpack.c.bf16 %v6465_v45, %v6464_v63  ;;  %v6485_v63 = vld [vmem:[#allocation50_spill] sm:$0xff]  ;;  %v6487_v45 = vld [vmem:[#allocation121_spill] sm:$0xff] }
 0x12c   : > { %3538 = vmatpush1.bf16.msk.msra.mxu0 %vm6441_vm5, %v6418_v50  ;;  %2354 = vmatprep.mubr.f32.mxu0 %v6444_v53  ;;  %v6468_v26 = vld [vmem:[#allocation111_spill] sm:$0xff]  ;;  %vm6486_vm4 = vnez %v6485_v63  ;;  %v6511_v63 = vld [vmem:[#allocation70_spill] sm:$0xff] }
 0x12d   : > { %3540 = vmatprep.subr.msk.bf16.mxu0 %vm6446_vm8, %v6418_v50  ;;  %1289 = vmatmul.mubr.f32.gmra.mrb[8].mxu1 %v6437_v15  ;;  %v3381_v24 = vpack.c.bf16 %v6512_v19, %v6511_v63 }
 0x12e   : > { %2356 = vmatmul.mubr.f32.gmra.mrb[10].mxu0 %v6447_v57  ;;  %3346 = vmatpush1.bf16.msra.mxu1 %v3345_v17  ;;  %v6457_v17 = vld [vmem:[#allocation36_spill] sm:$0xff] }
 0x12f   : > { %1295 = vmatprep.mubr.f32.mxu1 %v6444_v53  ;;  %3348 = vmatprep.subr.bf16.mxu1 %v3347_v9  ;;  %v3353_v23 = vpack.c.bf16 %v6457_v17, %v6456_v49  ;;  %v6461_v9 = vld [vmem:[#allocation37_spill] sm:$0xff]  ;;  %v6476_v49 = vld [vmem:[#allocation115_spill] sm:$0xff] }
 0x130   : > { %3542 = vmatpush1.bf16.msk.msra.mxu0 %vm6451_vm11, %v6418_v50  ;;  %2362 = vmatprep.mubr.f32.mxu0 %v6452_v14  ;;  %vm6462_vm6 = vnez %v6461_v9  ;;  %v6477_v17 = vld [vmem:[#allocation45_spill] sm:$0xff]  ;;  %v6484_v9 = vld [vmem:[#allocation119_spill] sm:$0xff] }
 0x131   : > { %3544 = vmatprep.subr.msk.bf16.mxu0 %vm6454_vm15, %v6418_v50  ;;  %1297 = vmatmul.mubr.f32.gmra.mrb[10].mxu1 %v6447_v57  ;;  %vm6478_vm13 = vnez %v6477_v17  ;;  %v6502_v17 = vld [vmem:[#allocation125_spill] sm:$0xff] }
 0x132   : > { %2364 = vmatmul.mubr.f32.gmra.mrb[12].mxu0 %v6455_v43  ;;  %3350 = vmatpush1.bf16.msra.mxu1 %v3349_v4  ;;  %v6469_v4 = vld [vmem:[#allocation41_spill] sm:$0xff] }
 0x133   : > { %1303 = vmatprep.mubr.f32.mxu1 %v6452_v14  ;;  %3352 = vmatprep.subr.bf16.mxu1 %v3351_v60  ;;  %v6466_v60 = vld [vmem:[#allocation38_spill] sm:$0xff]  ;;  %vm6470_vm1 = vnez %v6469_v4  ;;  %v6493_v4 = vld [vmem:[#allocation57_spill] sm:$0xff] }
 0x134   : > { %3546 = vmatpush1.bf16.msk.msra.mxu0 %vm6459_vm2, %v6418_v50  ;;  %2370 = vmatprep.mubr.f32.mxu0 %v6460_v2  ;;  %vm6467_vm10 = vnez %v6466_v60  ;;  %v6492_v60 = vld [vmem:[#allocation51_spill] sm:$0xff]  ;;  %vm6494_vm8 = vnez %v6493_v4 }
 0x135   : > { %3548 = vmatprep.subr.msk.bf16.mxu0 %vm6462_vm6, %v6418_v50  ;;  %1305 = vmatmul.mubr.f32.gmra.mrb[12].mxu1 %v6455_v43 }
 0x136   : > { %2372 = vmatmul.mubr.f32.gmra.mrb[14].mxu0 %v6463_v54  ;;  %3354 = vmatpush1.bf16.msra.mxu1 %v3353_v23  ;;  %v6479_v23 = vld [vmem:[#allocation117_spill] sm:$0xff] }
 0x137   : > { %1311 = vmatprep.mubr.f32.mxu1 %v6460_v2  ;;  %3356 = vmatprep.subr.bf16.mxu1 %v3355_v34  ;;  %v6474_v34 = vld [vmem:[#allocation43_spill] sm:$0xff] }
 0x138   : > { %3550 = vmatpush1.bf16.msk.msra.mxu0 %vm6467_vm10, %v6418_v50  ;;  %2378 = vmatprep.mubr.f32.mxu0 %v6468_v26  ;;  %vm6475_vm14 = vnez %v6474_v34 }
 0x139   : > { %3552 = vmatprep.subr.msk.bf16.mxu0 %vm6470_vm1, %v6418_v50  ;;  %1313 = vmatmul.mubr.f32.gmra.mrb[14].mxu1 %v6463_v54 }
 0x13a   : > { %2380 = vmatmul.mubr.f32.gmra.mrb[16].mxu0 %v6471_v6  ;;  %3358 = vmatpush1.bf16.msra.mxu1 %v3357_v59  ;;  %v6488_v59 = vld [vmem:[#allocation52_spill] sm:$0xff] }
 0x13b   : > { %1319 = vmatprep.mubr.f32.mxu1 %v6468_v26  ;;  %3360 = vmatprep.subr.bf16.mxu1 %v3359_v40  ;;  %v6482_v40 = vld [vmem:[#allocation48_spill] sm:$0xff]  ;;  %v3369_v42 = vpack.c.bf16 %v6489_v56, %v6488_v59  ;;  %v6515_v59 = vld [vmem:[#allocation69_spill] sm:$0xff]  ;;  %v6516_v56 = vld [vmem:[#allocation74_spill] sm:$0xff] }
 0x13c   : > { %3554 = vmatpush1.bf16.msk.msra.mxu0 %vm6475_vm14, %v6418_v50  ;;  %2386 = vmatprep.mubr.f32.mxu0 %v6476_v49  ;;  %vm6483_vm3 = vnez %v6482_v40  ;;  %v6510_v40 = vld [vmem:[#allocation127_spill] sm:$0xff]  ;;  %vm6517_vm6 = vnez %v6516_v56 }
 0x13d   : > { %3556 = vmatprep.subr.msk.bf16.mxu0 %vm6478_vm13, %v6418_v50  ;;  %1321 = vmatmul.mubr.f32.gmra.mrb[16].mxu1 %v6471_v6 }
 0x13e   : > { %2388 = vmatmul.mubr.f32.gmra.mrb[18].mxu0 %v6479_v23  ;;  %3362 = vmatpush1.bf16.msra.mxu1 %v3361_v21  ;;  %v6500_v21 = vld [vmem:[#allocation123_spill] sm:$0xff] }
 0x13f   : > { %1327 = vmatprep.mubr.f32.mxu1 %v6476_v49  ;;  %3364 = vmatprep.subr.bf16.mxu1 %v3363_v3  ;;  %v6490_v3 = vld [vmem:[#allocation54_spill] sm:$0xff] }
 0x140   : > { %3558 = vmatpush1.bf16.msk.msra.mxu0 %vm6483_vm3, %v6418_v50  ;;  %2394 = vmatprep.mubr.f32.mxu0 %v6484_v9  ;;  %vm6491_vm5 = vnez %v6490_v3  ;;  %v6519_v3 = vld [vmem:[#allocation76_spill] sm:$0xff] }
 0x141   : > { %3560 = vmatprep.subr.msk.bf16.mxu0 %vm6486_vm4, %v6418_v50  ;;  %1329 = vmatmul.mubr.f32.gmra.mrb[18].mxu1 %v6479_v23  ;;  %v3385_v61 = vpack.c.bf16 %v6520_v46, %v6519_v3 }
 0x142   : > { %2396 = vmatmul.mubr.f32.gmra.mrb[20].mxu0 %v6487_v45  ;;  %3366 = vmatpush1.bf16.msra.mxu1 %v3365_v18  ;;  %v6508_v18 = vld [vmem:[#allocation68_spill] sm:$0xff] }
 0x143   : > { %1335 = vmatprep.mubr.f32.mxu1 %v6484_v9  ;;  %3368 = vmatprep.subr.bf16.mxu1 %v3367_v10  ;;  %v6498_v10 = vld [vmem:[#allocation60_spill] sm:$0xff] }
 0x144   : > { %3562 = vmatpush1.bf16.msk.msra.mxu0 %vm6491_vm5, %v6418_v50  ;;  %2402 = vmatprep.mubr.f32.mxu0 %v6492_v60  ;;  %vm6499_vm11 = vnez %v6498_v10 }
 0x145   : > { %3564 = vmatprep.subr.msk.bf16.mxu0 %vm6494_vm8, %v6418_v50  ;;  %1337 = vmatmul.mubr.f32.gmra.mrb[20].mxu1 %v6487_v45 }
 0x146   : > { %2404 = vmatmul.mubr.f32.gmra.mrb[22].mxu0 %v6495_v29  ;;  %3370 = vmatpush1.bf16.msra.mxu1 %v3369_v42  ;;  %v6518_v42 = vld [vmem:[#allocation128_spill] sm:$0xff] }
 0x147   : > { %1343 = vmatprep.mubr.f32.mxu1 %v6492_v60  ;;  %3372 = vmatprep.subr.bf16.mxu1 %v3371_v27  ;;  %v6505_v27 = vld [vmem:[#allocation66_spill] sm:$0xff] }
 0x148   : > { %3566 = vmatpush1.bf16.msk.msra.mxu0 %vm6499_vm11, %v6418_v50  ;;  %2410 = vmatprep.mubr.f32.mxu0 %v6500_v21  ;;  %vm6506_vm15 = vnez %v6505_v27 }
 0x149   : > { %3568 = vmatprep.subr.msk.bf16.mxu0 %vm4809_vm7, %v6418_v50  ;;  %1345 = vmatmul.mubr.f32.gmra.mrb[22].mxu1 %v6495_v29  ;;  %vm6509_vm7 = vnez %v6508_v18 }
 0x14a   : > { %2412 = vmatmul.mubr.f32.gmra.mrb[24].mxu0 %v6502_v17  ;;  %3374 = vmatpush1.bf16.msra.mxu1 %v3373_v8 }
 0x14b   : > { %1351 = vmatprep.mubr.f32.mxu1 %v6500_v21  ;;  %3376 = vmatprep.subr.bf16.mxu1 %v3375_v47  ;;  %v6513_v47 = vld [vmem:[#allocation72_spill] sm:$0xff] }
 0x14c   : > { %3570 = vmatpush1.bf16.msk.msra.mxu0 %vm6506_vm15, %v6418_v50  ;;  %2418 = vmatprep.mubr.f32.mxu0 %v6507_v31  ;;  %vm6514_vm2 = vnez %v6513_v47 }
 0x14d   : > { %3572 = vmatprep.subr.msk.bf16.mxu0 %vm6509_vm7, %v6418_v50  ;;  %1353 = vmatmul.mubr.f32.gmra.mrb[24].mxu1 %v6502_v17 }
 0x14e   : > { %2420 = vmatmul.mubr.f32.gmra.mrb[26].mxu0 %v6510_v40  ;;  %3378 = vmatpush1.bf16.msra.mxu1 %v3377_v11 }
 0x14f   : > { %1359 = vmatprep.mubr.f32.mxu1 %v6507_v31  ;;  %3380 = vmatprep.subr.bf16.mxu1 %v3379_v1 }
 0x150   : > { %3574 = vmatpush1.bf16.msk.msra.mxu0 %vm6514_vm2, %v6418_v50  ;;  %2426 = vmatprep.mubr.f32.mxu0 %v6515_v59 }
 0x151   : > { %3576 = vmatprep.subr.msk.bf16.mxu0 %vm6517_vm6, %v6418_v50  ;;  %1361 = vmatmul.mubr.f32.gmra.mrb[26].mxu1 %v6510_v40 }
 0x152   : > { %2428 = vmatmul.mubr.f32.gmra.mrb[28].mxu0 %v6518_v42  ;;  %3382 = vmatpush1.bf16.msra.mxu1 %v3381_v24 }
 0x153   : > { %1367 = vmatprep.mubr.f32.mxu1 %v6515_v59  ;;  %3384 = vmatprep.subr.bf16.mxu1 %v3383_v22  ;;  %v6524_v22 = vld [vmem:[#allocation83_spill] sm:$0xff] }
 0x154   : > { %3578 = vmatpush1.bf16.msk.msra.mxu0 %vm4960_vm9, %v6418_v50  ;;  %2434 = vmatprep.mubr.f32.mxu0 %v5448_v25 }
 0x155   : > { %3580 = vmatprep.subr.msk.bf16.mxu0 %vm4975_vm12, %v6418_v50  ;;  %1369 = vmatmul.mubr.f32.gmra.mrb[28].mxu1 %v6518_v42 }
 0x156   : > { %2436 = vmatmul.mubr.f32.gmra.mrb[30].mxu0 %v5470_v55  ;;  %3386 = vmatpush1.bf16.msra.mxu1 %v3385_v61 }
 0x157   : > { %1375 = vmatprep.mubr.f32.mxu1 %v5448_v25  ;;  %3388 = vmatprep.subr.bf16.mxu1 %v3387_v36  ;;  %v6536_v36 = vld [vmem:[#allocation104_spill] sm:$0xff] }
 0x158   : > { %3582 = vmatpush1.bf16.msk.msra.mxu0 %vm5024_vm0, %v6418_v50  ;;  %2571 = vmatprep.mubr.f32.mxu0 %v4985_v38  ;;  %v6528_v38 = vld [vmem:[#allocation90_spill] sm:$0xff] }
 0x159   : > { %1377 = vmatmul.mubr.f32.gmra.mrb[30].mxu1 %v5470_v55  ;;  %v6530_v50 = vld [vmem:[#allocation94_spill] sm:$0xff] }
 0x15a   : > { %3390 = vmatpush1.bf16.msra.mxu1 %v3389_v32  ;;  %1577 = vmatprep.mubr.f32.mxu1 %v6524_v22 }
 0x15b   : > { %2573 = vmatmul.mubr.f32.vlgmr.msra.gmra.mrb[0].mxu0 %v6420_v44  ;;  %v6531_v44 = vld [vmem:[#allocation95_spill] sm:$0xff] }
 0x15c   : > { %2579 = vmatprep.mubr.f32.mxu0 %v6425_v12  ;;  %v6532_v12 = vld [vmem:[#allocation97_spill] sm:$0xff] }
 0x15d   : > { %1580 = vmatmul.mubr.f32.vlgmr.msra.gmra.mrb[0].mxu1 %v6525_v51 }
 0x15e   : > { %1587 = vmatprep.mubr.f32.mxu1 %v6526_v30 }
 0x15f   : > { %2581 = vmatmul.mubr.f32.gmra.mrb[2].mxu0 %v6427_v13  ;;  %v6535_v13 = vld [vmem:[#allocation102_spill] sm:$0xff] }
 0x160   : > { %2587 = vmatprep.mubr.f32.mxu0 %v5059_v48  ;;  %v6533_v48 = vld [vmem:[#allocation98_spill] sm:$0xff] }
 0x161   : > { %1590 = vmatmul.mubr.f32.gmra.mrb[2].mxu1 %v6527_v7 }
 0x162   : > { %1597 = vmatprep.mubr.f32.mxu1 %v6528_v38 }
 0x163   : > { %2589 = vmatmul.mubr.f32.gmra.mrb[4].mxu0 %v5080_v28  ;;  %v6534_v28 = vld [vmem:[#allocation100_spill] sm:$0xff] }
 0x164   : > { %2595 = vmatprep.mubr.f32.mxu0 %v6431_v41  ;;  %v6538_v41 = vld [vmem:[#allocation108_spill] sm:$0xff] }
 0x165   : > { %1600 = vmatmul.mubr.f32.gmra.mrb[4].mxu1 %v6529_v20 }
 0x166   : > { %1607 = vmatprep.mubr.f32.mxu1 %v6530_v50 }
 0x167   : > { %2597 = vmatmul.mubr.f32.gmra.mrb[6].mxu0 %v6433_v62  ;;  %v6539_v62 = vld [vmem:[#allocation110_spill] sm:$0xff] }
 0x168   : > { %2603 = vmatprep.mubr.f32.mxu0 %v5134_v37  ;;  %v6537_v37 = vld [vmem:[#allocation106_spill] sm:$0xff] }
 0x169   : > { %1610 = vmatmul.mubr.f32.gmra.mrb[6].mxu1 %v6531_v44 }
 0x16a   : > { %1617 = vmatprep.mubr.f32.mxu1 %v6532_v12 }
 0x16b   : > { %2605 = vmatmul.mubr.f32.gmra.mrb[8].mxu0 %v6437_v15  ;;  %v6540_v15 = vld [vmem:[#allocation113_spill] sm:$0xff] }
 0x16c   : > { %2611 = vmatprep.mubr.f32.mxu0 %v6444_v53  ;;  %v6541_v53 = vld [vmem:[#allocation114_spill] sm:$0xff] }
 0x16d   : > { %1620 = vmatmul.mubr.f32.gmra.mrb[8].mxu1 %v6533_v48 }
 0x16e   : > { %1627 = vmatprep.mubr.f32.mxu1 %v6534_v28 }
 0x16f   : > { %2613 = vmatmul.mubr.f32.gmra.mrb[10].mxu0 %v6447_v57  ;;  %v6542_v57 = vld [vmem:[#allocation116_spill] sm:$0xff] }
 0x170   : > { %2619 = vmatprep.mubr.f32.mxu0 %v6452_v14  ;;  %v6543_v14 = vld [vmem:[#allocation118_spill] sm:$0xff] }
 0x171   : > { %1630 = vmatmul.mubr.f32.gmra.mrb[10].mxu1 %v6535_v13 }
 0x172   : > { %1637 = vmatprep.mubr.f32.mxu1 %v6536_v36 }
 0x173   : > { %2621 = vmatmul.mubr.f32.gmra.mrb[12].mxu0 %v6455_v43  ;;  %v6544_v43 = vld [vmem:[#allocation120_spill] sm:$0xff] }
 0x174   : > { %2627 = vmatprep.mubr.f32.mxu0 %v6460_v2  ;;  %v6545_v2 = vld [vmem:[#allocation49_spill] sm:$0xff] }
 0x175   : > { %1640 = vmatmul.mubr.f32.gmra.mrb[12].mxu1 %v6537_v37 }
 0x176   : > { %1647 = vmatprep.mubr.f32.mxu1 %v6538_v41 }
 0x177   : > { %2629 = vmatmul.mubr.f32.gmra.mrb[14].mxu0 %v6463_v54  ;;  %v6546_v54 = vld [vmem:[#allocation55_spill] sm:$0xff] }
 0x178   : > { %2635 = vmatprep.mubr.f32.mxu0 %v6468_v26  ;;  %v6547_v26 = vld [vmem:[#allocation56_spill] sm:$0xff] }
 0x179   : > { %1650 = vmatmul.mubr.f32.gmra.mrb[14].mxu1 %v6539_v62 }
 0x17a   : > { %1657 = vmatprep.mubr.f32.mxu1 %v6540_v15 }
 0x17b   : > { %2637 = vmatmul.mubr.f32.gmra.mrb[16].mxu0 %v6471_v6  ;;  %v6548_v6 = vld [vmem:[#allocation124_spill] sm:$0xff] }
 0x17c   : > { %2643 = vmatprep.mubr.f32.mxu0 %v6476_v49  ;;  %v6549_v49 = vld [vmem:[#allocation62_spill] sm:$0xff] }
 0x17d   : > { %1660 = vmatmul.mubr.f32.gmra.mrb[16].mxu1 %v6541_v53 }
 0x17e   : > { %1667 = vmatprep.mubr.f32.mxu1 %v6542_v57 }
 0x17f   : > { %2645 = vmatmul.mubr.f32.gmra.mrb[18].mxu0 %v6479_v23  ;;  %v6550_v23 = vld [vmem:[#allocation126_spill] sm:$0xff] }
 0x180   : > { %2651 = vmatprep.mubr.f32.mxu0 %v6484_v9  ;;  %v6551_v9 = vld [vmem:[#allocation67_spill] sm:$0xff] }
 0x181   : > { %1670 = vmatmul.mubr.f32.gmra.mrb[18].mxu1 %v6543_v14 }
 0x182   : > { %1677 = vmatprep.mubr.f32.mxu1 %v6544_v43 }
 0x183   : > { %2653 = vmatmul.mubr.f32.gmra.mrb[20].mxu0 %v6487_v45  ;;  %v6552_v45 = vld [vmem:[#allocation73_spill] sm:$0xff] }
 0x184   : > { %2659 = vmatprep.mubr.f32.mxu0 %v6492_v60 }
 0x185   : > { %1680 = vmatmul.mubr.f32.gmra.mrb[20].mxu1 %v6545_v2 }
 0x186   : > { %1687 = vmatprep.mubr.f32.mxu1 %v6546_v54 }
 0x187   : > { %2661 = vmatmul.mubr.f32.gmra.mrb[22].mxu0 %v6495_v29 }
 0x188   : > { %2667 = vmatprep.mubr.f32.mxu0 %v6500_v21 }
 0x189   : > { %1690 = vmatmul.mubr.f32.gmra.mrb[22].mxu1 %v6547_v26 }
 0x18a   : > { %1697 = vmatprep.mubr.f32.mxu1 %v6548_v6 }
 0x18b   : > { %2669 = vmatmul.mubr.f32.gmra.mrb[24].mxu0 %v6502_v17 }
 0x18c   : > { %2675 = vmatprep.mubr.f32.mxu0 %v6507_v31 }
 0x18d   : > { %1700 = vmatmul.mubr.f32.gmra.mrb[24].mxu1 %v6549_v49 }
 0x18e   : > { %1707 = vmatprep.mubr.f32.mxu1 %v6550_v23 }
 0x18f   : > { %2677 = vmatmul.mubr.f32.gmra.mrb[26].mxu0 %v6510_v40 }
 0x190   : > { %2683 = vmatprep.mubr.f32.mxu0 %v6515_v59 }
 0x191   : > { %1710 = vmatmul.mubr.f32.gmra.mrb[26].mxu1 %v6551_v9 }
 0x192   : > { %1717 = vmatprep.mubr.f32.mxu1 %v5443_v35 }
 0x193   : > { %2685 = vmatmul.mubr.f32.gmra.mrb[28].mxu0 %v6518_v42 }
 0x194   : > { %2691 = vmatprep.mubr.f32.mxu0 %v5448_v25 }
 0x195   : > { %1720 = vmatmul.mubr.f32.gmra.mrb[28].mxu1 %v6552_v45 }
 0x196   : > { %1727 = vmatprep.mubr.f32.mxu1 %v5468_v16 }
 0x197   : > { %2693 = vmatmul.mubr.f32.gmra.mrb[30].mxu0 %v5470_v55 }
 0x199   : > { %1730 = vmatmul.mubr.f32.gmra.mrb[30].mxu1 %v5476_v52 }
 0x22e   : > { %v2574_v60 = vpop.f32.mrb[0].mxu0 }
 0x22f   : > { %v2576_v29 = vpop.f32.mrb[1].mxu0 }
 0x230   : > { %v1581_v33 = vpop.f32.mrb[0].mxu1 }
 0x231   : > { %v1583_v39 = vpop.f32.mrb[1].mxu1  ;;  %v3583_v8 = vadd.f32 %v2574_v60, %v1581_v33 }
 0x232   : > { %v2582_v10 = vpop.f32.mrb[2].mxu0  ;;  %v3584_v21 = vadd.f32 %v2576_v29, %v1583_v39 }
 0x233   : > { %2699 = vxpose.xlu0.b32.start [1/16] %v3583_v8, 128  ;;  %v2584_v35 = vpop.f32.mrb[3].mxu0 }
 0x234   : > { %2731 = vxpose.xlu1.b32.start [1/16] %v3584_v21, 128  ;;  %v1591_v34 = vpop.f32.mrb[2].mxu1 }
 0x235   : > { %v3585_v25 = vadd.f32 %v2582_v10, %v1591_v34  ;;  %v1593_v17 = vpop.f32.mrb[3].mxu1 }
 0x236   : > { %v3586_v0 = vadd.f32 %v2584_v35, %v1593_v17  ;;  %v2590_v58 = vpop.f32.mrb[4].mxu0 }
 0x237   : > { %2700 = vxpose.xlu0.b32.cont [2/16] %v3585_v25, 128  ;;  %v2592_v16 = vpop.f32.mrb[5].mxu0 }
 0x238   : > { %2732 = vxpose.xlu1.b32.cont [2/16] %v3586_v0, 128  ;;  %v1601_v55 = vpop.f32.mrb[4].mxu1 }
 0x239   : > { %v3587_v52 = vadd.f32 %v2590_v58, %v1601_v55  ;;  %v1603_v11 = vpop.f32.mrb[5].mxu1 }
 0x23a   : > { %v3588_v27 = vadd.f32 %v2592_v16, %v1603_v11  ;;  %v2598_v31 = vpop.f32.mrb[6].mxu0 }
 0x23b   : > { %2701 = vxpose.xlu0.b32.cont [3/16] %v3587_v52, 128  ;;  %v2600_v18 = vpop.f32.mrb[7].mxu0 }
 0x23c   : > { %2733 = vxpose.xlu1.b32.cont [3/16] %v3588_v27, 128  ;;  %v1611_v40 = vpop.f32.mrb[6].mxu1 }
 0x23d   : > { %v3589_v63 = vadd.f32 %v2598_v31, %v1611_v40  ;;  %v1613_v19 = vpop.f32.mrb[7].mxu1 }
 0x23e   : > { %v3590_v24 = vadd.f32 %v2600_v18, %v1613_v19  ;;  %v2606_v47 = vpop.f32.mrb[8].mxu0 }
 0x23f   : > { %2702 = vxpose.xlu0.b32.cont [4/16] %v3589_v63, 128  ;;  %v2608_v59 = vpop.f32.mrb[9].mxu0 }
 0x240   : > { %2734 = vxpose.xlu1.b32.cont [4/16] %v3590_v24, 128  ;;  %v1621_v56 = vpop.f32.mrb[8].mxu1 }
 0x241   : > { %v3591_v42 = vadd.f32 %v2606_v47, %v1621_v56  ;;  %v1623_v3 = vpop.f32.mrb[9].mxu1 }
 0x242   : > { %v3592_v46 = vadd.f32 %v2608_v59, %v1623_v3  ;;  %v2614_v61 = vpop.f32.mrb[10].mxu0 }
 0x243   : > { %2703 = vxpose.xlu0.b32.cont [5/16] %v3591_v42, 128  ;;  %v2616_v1 = vpop.f32.mrb[11].mxu0 }
 0x244   : > { %2735 = vxpose.xlu1.b32.cont [5/16] %v3592_v46, 128  ;;  %v1631_v4 = vpop.f32.mrb[10].mxu1 }
 0x245   : > { %v3593_v32 = vadd.f32 %v2614_v61, %v1631_v4  ;;  %v1633_v5 = vpop.f32.mrb[11].mxu1 }
 0x246   : > { %v3594_v22 = vadd.f32 %v2616_v1, %v1633_v5  ;;  %v2622_v51 = vpop.f32.mrb[12].mxu0 }
 0x247   : > { %2704 = vxpose.xlu0.b32.cont [6/16] %v3593_v32, 128  ;;  %v2624_v30 = vpop.f32.mrb[13].mxu0 }
 0x248   : > { %2736 = vxpose.xlu1.b32.cont [6/16] %v3594_v22, 128  ;;  %v1641_v7 = vpop.f32.mrb[12].mxu1 }
 0x249   : > { %v3595_v38 = vadd.f32 %v2622_v51, %v1641_v7  ;;  %v1643_v20 = vpop.f32.mrb[13].mxu1 }
 0x24a   : > { %v3596_v50 = vadd.f32 %v2624_v30, %v1643_v20  ;;  %v2630_v44 = vpop.f32.mrb[14].mxu0 }
 0x24b   : > { %2705 = vxpose.xlu0.b32.cont [7/16] %v3595_v38, 128  ;;  %v2632_v12 = vpop.f32.mrb[15].mxu0 }
 0x24c   : > { %2737 = vxpose.xlu1.b32.cont [7/16] %v3596_v50, 128  ;;  %v1651_v48 = vpop.f32.mrb[14].mxu1 }
 0x24d   : > { %v3597_v28 = vadd.f32 %v2630_v44, %v1651_v48  ;;  %v1653_v13 = vpop.f32.mrb[15].mxu1 }
 0x24e   : > { %v3598_v36 = vadd.f32 %v2632_v12, %v1653_v13  ;;  %v2638_v37 = vpop.f32.mrb[16].mxu0 }
 0x24f   : > { %2706 = vxpose.xlu0.b32.cont [8/16] %v3597_v28, 128  ;;  %v2640_v41 = vpop.f32.mrb[17].mxu0 }
 0x250   : > { %2738 = vxpose.xlu1.b32.cont [8/16] %v3598_v36, 128  ;;  %v1661_v62 = vpop.f32.mrb[16].mxu1 }
 0x251   : > { %v3599_v15 = vadd.f32 %v2638_v37, %v1661_v62  ;;  %v1663_v53 = vpop.f32.mrb[17].mxu1 }
 0x252   : > { %v3600_v57 = vadd.f32 %v2640_v41, %v1663_v53  ;;  %v2646_v14 = vpop.f32.mrb[18].mxu0 }
 0x253   : > { %2707 = vxpose.xlu0.b32.cont [9/16] %v3599_v15, 128  ;;  %v2648_v43 = vpop.f32.mrb[19].mxu0 }
 0x254   : > { %2739 = vxpose.xlu1.b32.cont [9/16] %v3600_v57, 128  ;;  %v1671_v2 = vpop.f32.mrb[18].mxu1 }
 0x255   : > { %v3601_v54 = vadd.f32 %v2646_v14, %v1671_v2  ;;  %v1673_v26 = vpop.f32.mrb[19].mxu1 }
 0x256   : > { %v3602_v6 = vadd.f32 %v2648_v43, %v1673_v26  ;;  %v2654_v49 = vpop.f32.mrb[20].mxu0 }
 0x257   : > { %2708 = vxpose.xlu0.b32.cont [10/16] %v3601_v54, 128  ;;  %v2656_v23 = vpop.f32.mrb[21].mxu0 }
 0x258   : > { %2740 = vxpose.xlu1.b32.cont [10/16] %v3602_v6, 128  ;;  %v1681_v9 = vpop.f32.mrb[20].mxu1 }
 0x259   : > { %v3603_v45 = vadd.f32 %v2654_v49, %v1681_v9  ;;  %v1683_v60 = vpop.f32.mrb[21].mxu1 }
 0x25a   : > { %v3604_v29 = vadd.f32 %v2656_v23, %v1683_v60  ;;  %v2662_v33 = vpop.f32.mrb[22].mxu0 }
 0x25b   : > { %2709 = vxpose.xlu0.b32.cont [11/16] %v3603_v45, 128  ;;  %v2664_v39 = vpop.f32.mrb[23].mxu0 }
 0x25c   : > { %2741 = vxpose.xlu1.b32.cont [11/16] %v3604_v29, 128  ;;  %v1691_v8 = vpop.f32.mrb[22].mxu1 }
 0x25d   : > { %v3605_v10 = vadd.f32 %v2662_v33, %v1691_v8  ;;  %v1693_v21 = vpop.f32.mrb[23].mxu1 }
 0x25e   : > { %v3606_v35 = vadd.f32 %v2664_v39, %v1693_v21  ;;  %v2670_v34 = vpop.f32.mrb[24].mxu0 }
 0x25f   : > { %2710 = vxpose.xlu0.b32.cont [12/16] %v3605_v10, 128  ;;  %v2672_v25 = vpop.f32.mrb[25].mxu0 }
 0x260   : > { %2742 = vxpose.xlu1.b32.cont [12/16] %v3606_v35, 128  ;;  %v1701_v17 = vpop.f32.mrb[24].mxu1 }
 0x261   : > { %v3607_v0 = vadd.f32 %v2670_v34, %v1701_v17  ;;  %v1703_v58 = vpop.f32.mrb[25].mxu1 }
 0x262   : > { %v3608_v16 = vadd.f32 %v2672_v25, %v1703_v58  ;;  %v2678_v55 = vpop.f32.mrb[26].mxu0 }
 0x263   : > { %2711 = vxpose.xlu0.b32.cont [13/16] %v3607_v0, 128  ;;  %v2680_v52 = vpop.f32.mrb[27].mxu0 }
 0x264   : > { %2743 = vxpose.xlu1.b32.cont [13/16] %v3608_v16, 128  ;;  %v1711_v11 = vpop.f32.mrb[26].mxu1 }
 0x265   : > { %v3609_v27 = vadd.f32 %v2678_v55, %v1711_v11  ;;  %v1713_v31 = vpop.f32.mrb[27].mxu1 }
 0x266   : > { %v3610_v18 = vadd.f32 %v2680_v52, %v1713_v31  ;;  %v2686_v40 = vpop.f32.mrb[28].mxu0 }
 0x267   : > { %2712 = vxpose.xlu0.b32.cont [14/16] %v3609_v27, 128  ;;  %v2688_v63 = vpop.f32.mrb[29].mxu0 }
 0x268   : > { %2744 = vxpose.xlu1.b32.cont [14/16] %v3610_v18, 128  ;;  %v1721_v19 = vpop.f32.mrb[28].mxu1 }
 0x269   : > { %v3611_v24 = vadd.f32 %v2686_v40, %v1721_v19  ;;  %v1723_v47 = vpop.f32.mrb[29].mxu1 }
 0x26a   : > { %v3612_v59 = vadd.f32 %v2688_v63, %v1723_v47  ;;  %v2694_v56 = vpop.f32.mrb[30].mxu0 }
 0x26b   : > { %2713 = vxpose.xlu0.b32.cont [15/16] %v3611_v24, 128  ;;  %v2696_v42 = vpop.f32.mrb[31].mxu0 }
 0x26c   : > { %2745 = vxpose.xlu1.b32.cont [15/16] %v3612_v59, 128  ;;  %v1731_v3 = vpop.f32.mrb[30].mxu1 }
 0x26d   : > { %v3613_v46 = vadd.f32 %v2694_v56, %v1731_v3  ;;  %v1733_v61 = vpop.f32.mrb[31].mxu1 }
 0x26e   : > { %v3614_v1 = vadd.f32 %v2696_v42, %v1733_v61 }
 0x26f   : > { %2714 = vxpose.xlu0.b32.end [16/16] %v3613_v46, 128 }
 0x270   : > { %2746 = vxpose.xlu1.b32.end [16/16] %v3614_v1, 128 }
 0x2b3   : > { %v2715_v4 = vpop.trf.xlu0 }
 0x2b4   : > { %2763 = vst [vmem:[%s5813_s21] sm:$0xff] %v2715_v4  ;;  %v2747_v32 = vpop.trf.xlu1 }
 0x2b5   : > { %2779 = vst [vmem:[%s5813_s21 + $0x80] sm:$0xff] %v2747_v32 }
 0x2b7   : > { %v2716_v5 = vpop.trf.xlu0 }
 0x2b8   : > { %2764 = vst [vmem:[%s5813_s21 + $0x8] sm:$0xff] %v2716_v5  ;;  %v2748_v22 = vpop.trf.xlu1 }
 0x2b9   : > { %2780 = vst [vmem:[%s5813_s21 + $0x88] sm:$0xff] %v2748_v22 }
 0x2bb   : > { %v2717_v51 = vpop.trf.xlu0 }
 0x2bc   : > { %2765 = vst [vmem:[%s5813_s21 + $0x10] sm:$0xff] %v2717_v51  ;;  %v2749_v30 = vpop.trf.xlu1 }
 0x2bd   : > { %2781 = vst [vmem:[%s5813_s21 + $0x90] sm:$0xff] %v2749_v30 }
 0x2bf   : > { %v2718_v7 = vpop.trf.xlu0 }
 0x2c0   : > { %2766 = vst [vmem:[%s5813_s21 + $0x18] sm:$0xff] %v2718_v7  ;;  %v2750_v38 = vpop.trf.xlu1 }
 0x2c1   : > { %2782 = vst [vmem:[%s5813_s21 + $0x98] sm:$0xff] %v2750_v38 }
 0x2c3   : > { %v2719_v20 = vpop.trf.xlu0 }
 0x2c4   : > { %2767 = vst [vmem:[%s5813_s21 + $0x20] sm:$0xff] %v2719_v20  ;;  %v2751_v50 = vpop.trf.xlu1 }
 0x2c5   : > { %2783 = vst [vmem:[%s5813_s21 + $0xa0] sm:$0xff] %v2751_v50 }
 0x2c7   : > { %v2720_v44 = vpop.trf.xlu0 }
 0x2c8   : > { %2768 = vst [vmem:[%s5813_s21 + $0x28] sm:$0xff] %v2720_v44  ;;  %v2752_v12 = vpop.trf.xlu1 }
 0x2c9   : > { %2784 = vst [vmem:[%s5813_s21 + $0xa8] sm:$0xff] %v2752_v12 }
 0x2cb   : > { %v2721_v48 = vpop.trf.xlu0 }
 0x2cc   : > { %2769 = vst [vmem:[%s5813_s21 + $0x30] sm:$0xff] %v2721_v48  ;;  %v2753_v28 = vpop.trf.xlu1 }
 0x2cd   : > { %2785 = vst [vmem:[%s5813_s21 + $0xb0] sm:$0xff] %v2753_v28 }
 0x2cf   : > { %v2722_v13 = vpop.trf.xlu0 }
 0x2d0   : > { %2770 = vst [vmem:[%s5813_s21 + $0x38] sm:$0xff] %v2722_v13  ;;  %v2754_v36 = vpop.trf.xlu1 }
 0x2d1   : > { %2786 = vst [vmem:[%s5813_s21 + $0xb8] sm:$0xff] %v2754_v36 }
 0x2d3   : > { %v2723_v37 = vpop.trf.xlu0 }
 0x2d4   : > { %2771 = vst [vmem:[%s5813_s21 + $0x40] sm:$0xff] %v2723_v37  ;;  %v2755_v41 = vpop.trf.xlu1 }
 0x2d5   : > { %2787 = vst [vmem:[%s5813_s21 + $0xc0] sm:$0xff] %v2755_v41 }
 0x2d7   : > { %v2724_v62 = vpop.trf.xlu0 }
 0x2d8   : > { %2772 = vst [vmem:[%s5813_s21 + $0x48] sm:$0xff] %v2724_v62  ;;  %v2756_v15 = vpop.trf.xlu1 }
 0x2d9   : > { %2788 = vst [vmem:[%s5813_s21 + $0xc8] sm:$0xff] %v2756_v15 }
 0x2db   : > { %v2725_v53 = vpop.trf.xlu0 }
 0x2dc   : > { %2773 = vst [vmem:[%s5813_s21 + $0x50] sm:$0xff] %v2725_v53  ;;  %v2757_v57 = vpop.trf.xlu1 }
 0x2dd   : > { %2789 = vst [vmem:[%s5813_s21 + $0xd0] sm:$0xff] %v2757_v57 }
 0x2df   : > { %v2726_v14 = vpop.trf.xlu0 }
 0x2e0   : > { %2774 = vst [vmem:[%s5813_s21 + $0x58] sm:$0xff] %v2726_v14  ;;  %v2758_v43 = vpop.trf.xlu1 }
 0x2e1   : > { %2790 = vst [vmem:[%s5813_s21 + $0xd8] sm:$0xff] %v2758_v43 }
 0x2e3   : > { %v2727_v2 = vpop.trf.xlu0 }
 0x2e4   : > { %2775 = vst [vmem:[%s5813_s21 + $0x60] sm:$0xff] %v2727_v2  ;;  %v2759_v54 = vpop.trf.xlu1 }
 0x2e5   : > { %2791 = vst [vmem:[%s5813_s21 + $0xe0] sm:$0xff] %v2759_v54 }
 0x2e7   : > { %v2728_v26 = vpop.trf.xlu0 }
 0x2e8   : > { %2776 = vst [vmem:[%s5813_s21 + $0x68] sm:$0xff] %v2728_v26  ;;  %v2760_v6 = vpop.trf.xlu1 }
 0x2e9   : > { %2792 = vst [vmem:[%s5813_s21 + $0xe8] sm:$0xff] %v2760_v6 }
 0x2eb   : > { %v2729_v49 = vpop.trf.xlu0 }
 0x2ec   : > { %2777 = vst [vmem:[%s5813_s21 + $0x70] sm:$0xff] %v2729_v49  ;;  %v2761_v23 = vpop.trf.xlu1 }
 0x2ed   : > { %2793 = vst [vmem:[%s5813_s21 + $0xf0] sm:$0xff] %v2761_v23 }
 0x2ef   : > { %v2730_v9 = vpop.trf.xlu0 }
 0x2f0   : > { %2778 = vst [vmem:[%s5813_s21 + $0x78] sm:$0xff] %v2730_v9  ;;  %v2762_v45 = vpop.trf.xlu1 }
 0x2f1   : > { %2794 = vst [vmem:[%s5813_s21 + $0xf8] sm:$0xff] %v2762_v45 }
 0x2f2   : > { %3889 = shalt.err (!%p3886_p2)
}
 0x2f3   : > { %s3890_s4 = scalar_lea.hbm %s5850_s3, 4096  ;;  %s3894_s27 = scalar_lea.hbm %s5905_s2, 8192 }
 0x2f4   : > { %p3891_p9 = scmp.ne.s32.totalorder %s5850_s3, %s3890_s4  ;;  %p3895_p6 = scmp.lt.u32.totalorder %s5850_s3, %s5905_s2 }
 0x2f5   : > { %p3896_p4 = scmp.lt.u32.totalorder %s3894_s27, %s3890_s4  ;;  %p3898_p0 = scmp.lt.u32.totalorder %s3890_s4, %s5850_s3 }
 0x2f6   : > { %p3892_p11 = pnand %p3891_p9, %p6553_p5 }
 0x2f7   : > { %p3897_p8 = por %p3896_p4, %p3895_p6 }
 0x2f8   : > { %p3893_p3 = pneg %p3892_p11 }
 0x2f9   : > { %p3899_p7 = por %p3898_p0, %p3897_p8 }
 0x2fb   : > { %p3900_p13 = pnand %p3899_p7, %p3893_p3 }
 0x2fd   : > { %3903 = shalt.err (!%p3900_p13)
}
 0x2fe   : > { %s3971_s29 = smov 128   ;;  %s3972_s21 = smov 8  }
 0x2ff   : > { %3747 = dma.vmem_to_hbm [thread:$0]  (%p6553_p5), %s5852_s19, 4096, %s5850_s3, %s2796_s7, %s3971_s29, %s3971_s29, %s3972_s21  }
 0x300 PF: > { %s2826_s16 = sand.u32 1, %s3942_s9   ;;  %p6554_p10 = scmp.ne.s32.totalorder %s6119_s24, 0 }
 0x301   : > { %p6555_p12 = scmp.ge.s32.totalorder %s3962_s14, 2  ;;  %s2827_s30 = scalar_lea.sflag [#allocation4], %s2826_s16 }
 0x303   : > { %p3757_p1 = pnand %p6555_p12, %p6554_p10 }
 0x305   : > { %3937 = dma.done.wait (!%p3757_p1), %s2827_s30, 4096  }
 0x306   : > { %3939 = vsyncadd (!%p3757_p1), %s2827_s30, 4294963200  ;;  %s21_s14 = sadd.s32 1, %s3962_s14   ;;  %s6556_s9 = smov %s3946_s10 }
 0x307   : > { %p18_p2 = scmp.ge.s32.totalorder %s21_s14, 4   ;;  %s6557_s10 = smov %s3950_s11 }
 0x308   : > { %s6558_s11 = smov %s4044_s23  ;;  %s6559_s12 = smov %s3958_s13 }
 0x309   : > { %s6560_s13 = smov %s6562_s17  ;;  %20 = sbr.rel (!%p18_p2) target bundleno = 8 (0x8), region = 86 }
 0x310   :  { %2832 = vsyncpa [#allocation3], 1 }
 0x311   :  { %2834 = vsyncpa [#allocation3 + $0x1], 1 }
 0x312   :  { %2835 = vsyncpa [#allocation6], 1 }
 0x313   :  { %2837 = vsyncpa [#allocation6 + $0x1], 1 }
 0x314   :  { %2838 = vsyncpa [#allocation4], 1 }
 0x315   :  { %2840 = vsyncpa [#allocation4 + $0x1], 1 }

</bundles_post_ra>
